<compile_context>
chip_gen: v5e
topology: v5e:2x2
jax: 0.10.0
libtpu: 0.0.40
codegen_flags: <defaults>
</compile_context>

<pallas_src>
import functools

import jax
import jax.numpy as jnp
from jax.experimental import pallas as pl
from jax.experimental.pallas import tpu as pltpu


def _round_up(a, b):
    return (a + b - 1) // b * b


_DEFAULT_VMEM_CAP = 64 * 1024 * 1024
_vmem_cap_cache = [None]


def _vmem_capacity_bytes():
    if _vmem_cap_cache[0] is None:
        try:
            info = pltpu.get_tpu_info()
            _vmem_cap_cache[0] = int(getattr(info, "vmem_capacity_bytes",
                                             _DEFAULT_VMEM_CAP))
        except Exception:  # no TPU info available at trace time
            _vmem_cap_cache[0] = _DEFAULT_VMEM_CAP
    return _vmem_cap_cache[0]


def _ffn_kernel(x_ref, w1_ref, b1_ref, w2_ref, b2_ref, o_ref, acc_ref):
    # x_ref: (bm, E_p) cdt, w1_ref: (E_p, tH) cdt, b1_ref: (1, tH) f32,
    # w2_ref: (tH, E_p) cdt, b2_ref: (1, E_p) f32,
    # o_ref: (bm, E_p) out dtype, acc_ref: (bm, E_p) f32.
    k = pl.program_id(1)

    x = x_ref[...]

    # Linear 1 (MXU, f32 accumulate) + bias over this hidden-dim tile.
    h = jnp.dot(x, w1_ref[...], preferred_element_type=jnp.float32) + b1_ref[...]

    # Exact GELU (erf form), matching torch.nn.GELU() default.
    inv_sqrt2 = jnp.float32(0.7071067811865476)
    h = 0.5 * h * (1.0 + jax.lax.erf(h * inv_sqrt2))

    # Partial Linear 2 for this hidden tile (bf16/cdt operands, f32 accumulate).
    partial = jnp.dot(h.astype(w2_ref.dtype), w2_ref[...],
                      preferred_element_type=jnp.float32)

    # Fold init into the first k-step: no zero-fill store + reload.
    @pl.when(k == 0)
    def _():
        acc_ref[...] = partial

    @pl.when(k > 0)
    def _():
        acc_ref[...] += partial

    @pl.when(k == pl.num_programs(1) - 1)
    def _():
        o_ref[...] = (acc_ref[...] + b2_ref[...]).astype(o_ref.dtype)


def make_ffn_params(w1, b1, w2, b2, compute_dtype=jnp.bfloat16):
    """Pad weights/biases to lane-dense (128-multiple) shapes and cast ONCE.

    w1: (E, H), b1: (H,), w2: (H, E), b2: (E,) -- (in, out) layout
    (pre-transposed vs. PyTorch nn.Linear's (out, in)).
    Zero padding is mathematically exact: padded x cols / W1 rows contribute 0,
    GELU(0)=0, padded W2 rows are 0, padded output cols are sliced off.
    """
    E, H = w1.shape
    E_p = _round_up(E, 128)
    H_p = _round_up(H, 128)
    if (E_p, H_p) != (E, H):
        w1 = jnp.pad(w1, ((0, E_p - E), (0, H_p - H)))
        w2 = jnp.pad(w2, ((0, H_p - H), (0, E_p - E)))
        b1 = jnp.pad(b1, (0, H_p - H))
        b2 = jnp.pad(b2, (0, E_p - E))
    w1p = w1.astype(compute_dtype)
    w2p = w2.astype(compute_dtype)
    b1p = b1.reshape(1, H_p).astype(jnp.float32)
    b2p = b2.reshape(1, E_p).astype(jnp.float32)
    return w1p, b1p, w2p, b2p


@functools.partial(jax.jit, static_argnames=("block_m", "block_h"))
def feed_forward(x, w1p, b1p, w2p, b2p, *, block_m=None, block_h=None):
    """x: (..., E). w1p/b1p/w2p/b2p: outputs of make_ffn_params (pre-padded)."""
    orig_shape = x.shape
    E = orig_shape[-1]
    E_p, H_p = w1p.shape
    cdt = w1p.dtype
    out_dtype = x.dtype

    # --- generation-aware VMEM budget & default tile sizes -------------------
    vmem_cap = _vmem_capacity_bytes()
    budget = int(vmem_cap * 0.8)                 # ~51 MiB on v7x, ~102 MiB on v5e/v6e
    big_vmem = vmem_cap >= 96 * 1024 * 1024
    if block_m is None:
        block_m = 512 if big_vmem else 256
    if block_h is None:
        block_h = 1024 if big_vmem else 256
    block_m = max(128, _round_up(int(block_m), 128))   # enforce (8,128)-friendly tiles
    block_h = max(128, _round_up(int(block_h), 128))

    x2d = x.reshape(-1, E).astype(cdt)
    n_tok = x2d.shape[0]
    rows128 = _round_up(max(n_tok, 1), 128)

    # Row tile: clamp to available rows, and keep >=2 row blocks when possible
    # so the "parallel" axis can shard across v7x's two TensorCores.
    bm = min(block_m, rows128)
    if rows128 >= 256 and rows128 // bm < 2:
        bm = max(128, ((rows128 // 2) // 128) * 128)

    c_sz = jnp.dtype(cdt).itemsize
    o_sz = jnp.dtype(out_dtype).itemsize

    def vmem_est(bm_, th_):
        dbl = 2 * (bm_ * E_p * c_sz + E_p * th_ * c_sz + th_ * 4
                   + th_ * E_p * c_sz + E_p * 4 + bm_ * E_p * o_sz)
        return dbl + bm_ * E_p * 4               # + f32 accumulator

    # Hidden tile: largest 128-multiple divisor of H_p that fits budget & block_h.
    m = H_p // 128
    divisors = sorted({128 * d for d in range(1, m + 1) if m % d == 0}, reverse=True)
    tH = divisors[-1]
    for cand in divisors:
        if cand <= block_h and vmem_est(bm, cand) <= budget:
            tH = cand
            break
    while vmem_est(bm, tH) > budget and bm > 128:
        bm = max(128, ((bm // 2) // 128) * 128)

    n_rows = _round_up(rows128, bm)

    # --- pad activations only (weights were pre-padded at load time) ---------
    if n_rows > n_tok or E_p > E:
        x2d = jnp.pad(x2d, ((0, n_rows - n_tok), (0, E_p - E)))

    grid = (n_rows // bm, H_p // tH)
    n_row_blocks = grid[0]

    vmem_limit = int(min(max(vmem_est(bm, tH) * 5 // 4, 32 * 1024 * 1024), budget))

    cost = pl.CostEstimate(
        flops=int(4 * n_rows * E_p * H_p),            # two matmuls
        transcendentals=int(n_rows * H_p),            # erf
        bytes_accessed=int(
            x2d.size * c_sz                           # activations read once
            + n_row_blocks * (w1p.size * c_sz + w2p.size * c_sz
                              + b1p.size * 4 + b2p.size * 4)   # re-streamed per row tile
            + n_rows * E_p * o_sz),                   # output write
    )

    out = pl.pallas_call(
        _ffn_kernel,
        out_shape=jax.ShapeDtypeStruct((n_rows, E_p), out_dtype),
        grid_spec=pltpu.PrefetchScalarGridSpec(
            num_scalar_prefetch=0,
            grid=grid,
            in_specs=[
                pl.BlockSpec((bm, E_p), lambda i, k: (i, 0)),   # x rows (resident over k)
                pl.BlockSpec((E_p, tH), lambda i, k: (0, k)),   # W1 hidden tile
                pl.BlockSpec((1, tH), lambda i, k: (0, k)),     # b1 hidden tile
                pl.BlockSpec((tH, E_p), lambda i, k: (k, 0)),   # W2 hidden tile
                pl.BlockSpec((1, E_p), lambda i, k: (0, 0)),    # b2 (full)
            ],
            out_specs=pl.BlockSpec((bm, E_p), lambda i, k: (i, 0)),
            scratch_shapes=[pltpu.VMEM((bm, E_p), jnp.float32)],
        ),
        compiler_params=pltpu.CompilerParams(
            dimension_semantics=("parallel", "arbitrary"),
            vmem_limit_bytes=vmem_limit,
        ),
        cost_estimate=cost,
    )(x2d, w1p, b1p, w2p, b2p)

    out = out[:n_tok, :E]
    return out.reshape(orig_shape)


def _reference(x, w1, b1, w2, b2):
    h = x @ w1 + b1
    h = 0.5 * h * (1.0 + jax.lax.erf(h * jnp.float32(0.7071067811865476)))
    return h @ w2 + b2


if __name__ == "__main__":
    # Small shapes implied by the module: tokens with embed_dim features.
    batch, seq, embed_dim, hidden_dim = 2, 8, 32, 64

    key = jax.random.PRNGKey(0)
    kx, k1, kb1, k2, kb2 = jax.random.split(key, 5)

    x = jax.random.normal(kx, (batch, seq, embed_dim), dtype=jnp.float32)

    # PyTorch Linear shapes are (out, in); stored pre-transposed as (in, out).
    w1 = jax.random.normal(k1, (embed_dim, hidden_dim), dtype=jnp.float32) * 0.05
    b1 = jax.random.normal(kb1, (hidden_dim,), dtype=jnp.float32) * 0.05
    w2 = jax.random.normal(k2, (hidden_dim, embed_dim), dtype=jnp.float32) * 0.05
    b2 = jax.random.normal(kb2, (embed_dim,), dtype=jnp.float32) * 0.05

    ref = _reference(x, w1, b1, w2, b2)

    # Exact-precision path (f32 compute) -> tight tolerance vs erf reference.
    params_f32 = make_ffn_params(w1, b1, w2, b2, compute_dtype=jnp.float32)
    out_f32 = feed_forward(x, *params_f32)
    jax.block_until_ready(out_f32)
    assert out_f32.shape == x.shape
    assert jnp.allclose(out_f32, ref, atol=1e-5, rtol=1e-5), "f32 mismatch vs reference"

    # Default fast path: bf16 MXU operands, f32 accumulation.
    params_bf16 = make_ffn_params(w1, b1, w2, b2)  # compute_dtype=bf16
    out_bf16 = feed_forward(x, *params_bf16)
    jax.block_until_ready(out_bf16)
    assert out_bf16.shape == x.shape
    assert jnp.allclose(out_bf16, ref, atol=3e-2, rtol=3e-2), "bf16 mismatch vs reference"

    print("KERNEL_OK")
</pallas_src>

<mosaic_0001>
module attributes {stable_mosaic.version = 11 : i64} {
  func.func @_ffn_kernel(%arg0: i32, %arg1: i32, %arg2: memref<128x128xf32, #tpu.memory_space<vmem>>, %arg3: memref<128x128xf32, #tpu.memory_space<vmem>>, %arg4: memref<1x128xf32, #tpu.memory_space<vmem>>, %arg5: memref<128x128xf32, #tpu.memory_space<vmem>>, %arg6: memref<1x128xf32, #tpu.memory_space<vmem>>, %arg7: memref<128x128xf32, #tpu.memory_space<vmem>>, %arg8: memref<128x128xf32, #tpu.memory_space<vmem>>) attributes {dimension_semantics = [#tpu.dimension_semantics<parallel>, #tpu.dimension_semantics<arbitrary>], iteration_bounds = array<i64: 1, 1>, scalar_prefetch = 0 : i64, scratch_operands = 1 : i64, tpu.core_type = #tpu.core_type<tc>, window_params = [{transform_indices = @transform_0, window_bounds = array<i64: 128, 128>}, {transform_indices = @transform_1, window_bounds = array<i64: 128, 128>}, {transform_indices = @transform_2, window_bounds = array<i64: 1, 128>}, {transform_indices = @transform_3, window_bounds = array<i64: 128, 128>}, {pipeline_mode = #tpu.pipeline_mode<synchronous>, transform_indices = @transform_4, window_bounds = array<i64: 1, 128>}, {transform_indices = @transform_5, window_bounds = array<i64: 128, 128>}]} {
    %c0 = arith.constant 0 : index
    %c0_0 = arith.constant 0 : index
    %0 = vector.load %arg2[%c0, %c0_0] : memref<128x128xf32, #tpu.memory_space<vmem>>, vector<128x128xf32>
    %c0_1 = arith.constant 0 : index
    %c0_2 = arith.constant 0 : index
    %1 = vector.load %arg3[%c0_1, %c0_2] : memref<128x128xf32, #tpu.memory_space<vmem>>, vector<128x128xf32>
    %cst = arith.constant dense<0.000000e+00> : vector<128x128xf32>
    %2 = tpu.matmul %0, %1, %cst {dimension_numbers = #tpu.dot_dimension_numbers<[1], [0], [0], [1], [0, 0, 1, 1], [], []>} : vector<128x128xf32>, vector<128x128xf32>, vector<128x128xf32> -> vector<128x128xf32>
    %c0_3 = arith.constant 0 : index
    %c0_4 = arith.constant 0 : index
    %3 = vector.load %arg4[%c0_3, %c0_4] : memref<1x128xf32, #tpu.memory_space<vmem>>, vector<1x128xf32>
    %4 = vector.broadcast %3 : vector<1x128xf32> to vector<128x128xf32>
    %5 = arith.addf %2, %4 : vector<128x128xf32>
    %cst_5 = arith.constant 5.000000e-01 : f32
    %6 = vector.broadcast %cst_5 : f32 to vector<128x128xf32>
    %7 = arith.mulf %6, %5 : vector<128x128xf32>
    %cst_6 = arith.constant 0.707106769 : f32
    %8 = vector.broadcast %cst_6 : f32 to vector<128x128xf32>
    %9 = arith.mulf %5, %8 : vector<128x128xf32>
    %10 = math.erf %9 : vector<128x128xf32>
    %cst_7 = arith.constant 1.000000e+00 : f32
    %11 = vector.broadcast %cst_7 : f32 to vector<128x128xf32>
    %12 = arith.addf %11, %10 : vector<128x128xf32>
    %13 = arith.mulf %7, %12 : vector<128x128xf32>
    %c0_8 = arith.constant 0 : index
    %c0_9 = arith.constant 0 : index
    %14 = vector.load %arg5[%c0_8, %c0_9] : memref<128x128xf32, #tpu.memory_space<vmem>>, vector<128x128xf32>
    %cst_10 = arith.constant dense<0.000000e+00> : vector<128x128xf32>
    %15 = tpu.matmul %13, %14, %cst_10 {dimension_numbers = #tpu.dot_dimension_numbers<[1], [0], [0], [1], [0, 0, 1, 1], [], []>} : vector<128x128xf32>, vector<128x128xf32>, vector<128x128xf32> -> vector<128x128xf32>
    %c0_i32 = arith.constant 0 : i32
    %16 = arith.cmpi eq, %arg1, %c0_i32 : i32
    %17 = arith.extui %16 : i1 to i32
    %c0_i32_11 = arith.constant 0 : i32
    %18 = arith.cmpi ne, %17, %c0_i32_11 : i32
    scf.if %18 {
      %c0_16 = arith.constant 0 : index
      %c0_17 = arith.constant 0 : index
      %25 = vector.load %arg8[%c0_16, %c0_17] : memref<128x128xf32, #tpu.memory_space<vmem>>, vector<128x128xf32>
      tpu.vector_store %arg8[%c0_16, %c0_17], %15 {strides = array<i32>} : memref<128x128xf32, #tpu.memory_space<vmem>>, vector<128x128xf32>,
    } else {
    }
    %c0_i32_12 = arith.constant 0 : i32
    %19 = arith.cmpi sgt, %arg1, %c0_i32_12 : i32
    %20 = arith.extui %19 : i1 to i32
    %c0_i32_13 = arith.constant 0 : i32
    %21 = arith.cmpi ne, %20, %c0_i32_13 : i32
    scf.if %21 {
      %c0_16 = arith.constant 0 : index
      %c0_17 = arith.constant 0 : index
      %25 = vector.load %arg8[%c0_16, %c0_17] : memref<128x128xf32, #tpu.memory_space<vmem>>, vector<128x128xf32>
      %26 = arith.addf %25, %15 : vector<128x128xf32>
      %c0_18 = arith.constant 0 : index
      %c0_19 = arith.constant 0 : index
      %27 = vector.load %arg8[%c0_18, %c0_19] : memref<128x128xf32, #tpu.memory_space<vmem>>, vector<128x128xf32>
      tpu.vector_store %arg8[%c0_18, %c0_19], %26 {strides = array<i32>} : memref<128x128xf32, #tpu.memory_space<vmem>>, vector<128x128xf32>,
    } else {
    }
    %c0_i32_14 = arith.constant 0 : i32
    %22 = arith.cmpi eq, %arg1, %c0_i32_14 : i32
    %23 = arith.extui %22 : i1 to i32
    %c0_i32_15 = arith.constant 0 : i32
    %24 = arith.cmpi ne, %23, %c0_i32_15 : i32
    scf.if %24 {
      %c0_16 = arith.constant 0 : index
      %c0_17 = arith.constant 0 : index
      %25 = vector.load %arg8[%c0_16, %c0_17] : memref<128x128xf32, #tpu.memory_space<vmem>>, vector<128x128xf32>
      %c0_18 = arith.constant 0 : index
      %c0_19 = arith.constant 0 : index
      %26 = vector.load %arg6[%c0_18, %c0_19] : memref<1x128xf32, #tpu.memory_space<vmem>>, vector<1x128xf32>
      %27 = vector.broadcast %26 : vector<1x128xf32> to vector<128x128xf32>
      %28 = arith.addf %25, %27 : vector<128x128xf32>
      %c0_20 = arith.constant 0 : index
      %c0_21 = arith.constant 0 : index
      %29 = vector.load %arg7[%c0_20, %c0_21] : memref<128x128xf32, #tpu.memory_space<vmem>>, vector<128x128xf32>
      tpu.vector_store %arg7[%c0_20, %c0_21], %28 {strides = array<i32>} : memref<128x128xf32, #tpu.memory_space<vmem>>, vector<128x128xf32>,
    } else {
    }
    return
  }
  func.func @transform_0(%arg0: i32, %arg1: i32) -> (i32, i32) {
    %c0_i32 = arith.constant 0 : i32
    %c0_i32_0 = arith.constant 0 : i32
    return %arg0, %c0_i32 : i32, i32
  }
  func.func @transform_1(%arg0: i32, %arg1: i32) -> (i32, i32) {
    %c0_i32 = arith.constant 0 : i32
    %c0_i32_0 = arith.constant 0 : i32
    return %c0_i32, %arg1 : i32, i32
  }
  func.func @transform_2(%arg0: i32, %arg1: i32) -> (i32, i32) {
    %c0_i32 = arith.constant 0 : i32
    %c0_i32_0 = arith.constant 0 : i32
    return %c0_i32, %arg1 : i32, i32
  }
  func.func @transform_3(%arg0: i32, %arg1: i32) -> (i32, i32) {
    %c0_i32 = arith.constant 0 : i32
    %c0_i32_0 = arith.constant 0 : i32
    return %arg1, %c0_i32 : i32, i32
  }
  func.func @transform_4(%arg0: i32, %arg1: i32) -> (i32, i32) {
    %c0_i32 = arith.constant 0 : i32
    %c0_i32_0 = arith.constant 0 : i32
    %c0_i32_1 = arith.constant 0 : i32
    return %c0_i32, %c0_i32_0 : i32, i32
  }
  func.func @transform_5(%arg0: i32, %arg1: i32) -> (i32, i32) {
    %c0_i32 = arith.constant 0 : i32
    %c0_i32_0 = arith.constant 0 : i32
    return %arg0, %c0_i32 : i32, i32
  }
}

</mosaic_0001>

<bundles_post_ra>
// kernel: feed_forward.1
= control target key start
LH: loop header
LB: loop body
LE: loop exit
PB: predicated region body
PF: predicated region fallthrough
CT: control target
= control target key end

     0   :  { %10 = vsyncpa [#allocation4], 0  ;;  %s1165_s21 = smov [#allocation3]   ;;  %s1166_s23 = smov 128   ;;  %s1993_s0 = inlined_call_operand.vmem [shape: f32[128,128], index: 0, kind: input, shape index: {}]   ;;  %s1994_s1 = inlined_call_operand.vmem [shape: f32[128,128], index: 1, kind: input, shape index: {}]   ;;  %s1995_s2 = inlined_call_operand.vmem [shape: f32[1,128], index: 2, kind: input, shape index: {}]   ;;  %s1996_s3 = inlined_call_operand.hbm [shape: f32[128,128], index: 3, kind: input, shape index: {}]   ;;  %s1997_s4 = inlined_call_operand.vmem [shape: f32[1,128], index: 4, kind: input, shape index: {}]   ;;  %s1998_s5 = inlined_call_operand.vmem [shape: f32[128,128], index: 5, kind: output, shape index: {}]  }
   0x1   :  { %s21_s20 = sshll.u32 %s1996_s3, 4  ;;  %s23_s22 = sshll.u32 %s1165_s21, 4  ;;  %s22_s20 = int_to_ptr.hbm [resolvable:$true] %s21_s20  ;;  %s24_s22 = int_to_ptr.vmem [resolvable:$true] %s23_s22 }
   0x2   :  { %s1167_s24 = smov 8  }
   0x3   :  { %29 = dma.hbm_to_vmem [thread:$0]  %s22_s20, 2048, %s24_s22, [#allocation4], %s1166_s23, %s1166_s23, %s1167_s24  }
   0x4   :  { %1163 = dma.done.wait [#allocation4], 2048  }
   0x5   :  { %1164 = vsyncadd [#allocation4], 4294965248  ;;  %v67_v0 = vld [vmem:[%s1994_s1 + $0x78] sm:$0xff]  ;;  %v66_v1 = vld [vmem:[%s1994_s1 + $0x70] sm:$0xff] }
   0x6   :  { %72 = vmatpush.msra.mxu0 %v67_v0  ;;  %1070 = vmatpush.msra.mxu2 %v67_v0  ;;  %v65_v2 = vld [vmem:[%s1994_s1 + $0x68] sm:$0xff]  ;;  %v64_v3 = vld [vmem:[%s1994_s1 + $0x60] sm:$0xff]  ;;  %v63_v4 = vld [vmem:[%s1994_s1 + $0x58] sm:$0xff] }
   0x7   :  { %v62_v5 = vld [vmem:[%s1994_s1 + $0x50] sm:$0xff]  ;;  %v61_v6 = vld [vmem:[%s1994_s1 + $0x48] sm:$0xff]  ;;  %v60_v7 = vld [vmem:[%s1994_s1 + $0x40] sm:$0xff] }
   0x8   :  { %73 = vmatpush.msra.mxu0 %v66_v1  ;;  %1071 = vmatpush.msra.mxu2 %v66_v1  ;;  %v59_v8 = vld [vmem:[%s1994_s1 + $0x38] sm:$0xff]  ;;  %v58_v9 = vld [vmem:[%s1994_s1 + $0x30] sm:$0xff]  ;;  %v57_v10 = vld [vmem:[%s1994_s1 + $0x28] sm:$0xff] }
   0x9   :  { %v56_v11 = vld [vmem:[%s1994_s1 + $0x20] sm:$0xff]  ;;  %v55_v12 = vld [vmem:[%s1994_s1 + $0x18] sm:$0xff]  ;;  %v54_v13 = vld [vmem:[%s1994_s1 + $0x10] sm:$0xff] }
   0xa   :  { %74 = vmatpush.msra.mxu0 %v65_v2  ;;  %1072 = vmatpush.msra.mxu2 %v65_v2  ;;  %v53_v14 = vld [vmem:[%s1994_s1 + $0x8] sm:$0xff]  ;;  %v52_v15 = vld [vmem:[%s1994_s1] sm:$0xff]  ;;  %v38_v20 = vld [vmem:[%s1993_s0 + $0x10] sm:$0xff] }
   0xb   :  { %v36_v16 = vld [vmem:[%s1993_s0] sm:$0xff]  ;;  %v37_v18 = vld [vmem:[%s1993_s0 + $0x8] sm:$0xff]  ;;  %v46_v21 = vld [vmem:[%s1993_s0 + $0x50] sm:$0xff] }
   0xc   :  { %75 = vmatpush.msra.mxu0 %v64_v3  ;;  %1073 = vmatpush.msra.mxu2 %v64_v3  ;;  %v44_v17 = vld [vmem:[%s1993_s0 + $0x40] sm:$0xff]  ;;  %v45_v19 = vld [vmem:[%s1993_s0 + $0x48] sm:$0xff]  ;;  %v39_v22 = vld [vmem:[%s1993_s0 + $0x18] sm:$0xff] }
   0xd   :  { %v47_v23 = vld [vmem:[%s1993_s0 + $0x58] sm:$0xff]  ;;  %v40_v24 = vld [vmem:[%s1993_s0 + $0x20] sm:$0xff]  ;;  %v41_v26 = vld [vmem:[%s1993_s0 + $0x28] sm:$0xff] }
   0xe   :  { %76 = vmatpush.msra.mxu0 %v63_v4  ;;  %1074 = vmatpush.msra.mxu2 %v63_v4  ;;  %v48_v25 = vld [vmem:[%s1993_s0 + $0x60] sm:$0xff]  ;;  %v49_v27 = vld [vmem:[%s1993_s0 + $0x68] sm:$0xff]  ;;  %v42_v28 = vld [vmem:[%s1993_s0 + $0x30] sm:$0xff] }
   0xf   :  { %v50_v29 = vld [vmem:[%s1993_s0 + $0x70] sm:$0xff]  ;;  %v43_v30 = vld [vmem:[%s1993_s0 + $0x38] sm:$0xff]  ;;  %v854_v34 = vld [vmem:[#allocation3 + $0x68] sm:$0xff] }
  0x10   :  { %77 = vmatpush.msra.mxu0 %v62_v5  ;;  %1075 = vmatpush.msra.mxu2 %v62_v5  ;;  %v51_v31 = vld [vmem:[%s1993_s0 + $0x78] sm:$0xff]  ;;  %v855_v33 = vld [vmem:[#allocation3 + $0x70] sm:$0xff]  ;;  %v1300_v35 = vld [vmem:[%s1995_s2] ss:$0 sm:$0xff] }
  0x11   :  { %v856_v32 = vld [vmem:[#allocation3 + $0x78] sm:$0xff]  ;;  %v853_v36 = vld [vmem:[#allocation3 + $0x60] sm:$0xff]  ;;  %v851_v40 = vld [vmem:[#allocation3 + $0x50] sm:$0xff] }
  0x12   :  { %78 = vmatpush.msra.mxu0 %v61_v6  ;;  %1076 = vmatpush.msra.mxu2 %v61_v6  ;;  %v852_v38 = vld [vmem:[#allocation3 + $0x58] sm:$0xff]  ;;  %v850_v42 = vld [vmem:[#allocation3 + $0x48] sm:$0xff]  ;;  %v849_v45 = vld [vmem:[#allocation3 + $0x40] sm:$0xff] }
  0x13   :  { %857 = vmatpush.msra.mxu1 %v856_v32  ;;  %1086 = vmatpush.msra.mxu3 %v856_v32  ;;  %v848_v49 = vld [vmem:[#allocation3 + $0x38] sm:$0xff]  ;;  %v847_v56 = vld [vmem:[#allocation3 + $0x30] sm:$0xff]  ;;  %v846_v60 = vld [vmem:[#allocation3 + $0x28] sm:$0xff] }
  0x14   :  { %79 = vmatpush.msra.mxu0 %v60_v7  ;;  %1077 = vmatpush.msra.mxu2 %v60_v7  ;;  %v845_v3 = vld [vmem:[#allocation3 + $0x20] sm:$0xff]  ;;  %v844_v7 = vld [vmem:[#allocation3 + $0x18] sm:$0xff] }
  0x15   :  { %858 = vmatpush.msra.mxu1 %v855_v33  ;;  %1087 = vmatpush.msra.mxu3 %v855_v33 }
  0x16   :  { %80 = vmatpush.msra.mxu0 %v59_v8  ;;  %1078 = vmatpush.msra.mxu2 %v59_v8 }
  0x17   :  { %859 = vmatpush.msra.mxu1 %v854_v34  ;;  %1088 = vmatpush.msra.mxu3 %v854_v34 }
  0x18   :  { %81 = vmatpush.msra.mxu0 %v58_v9  ;;  %1079 = vmatpush.msra.mxu2 %v58_v9 }
  0x19   :  { %860 = vmatpush.msra.mxu1 %v853_v36  ;;  %1089 = vmatpush.msra.mxu3 %v853_v36 }
  0x1a   :  { %82 = vmatpush.msra.mxu0 %v57_v10  ;;  %1080 = vmatpush.msra.mxu2 %v57_v10 }
  0x1b   :  { %861 = vmatpush.msra.mxu1 %v852_v38  ;;  %1090 = vmatpush.msra.mxu3 %v852_v38 }
  0x1c   :  { %83 = vmatpush.msra.mxu0 %v56_v11  ;;  %1081 = vmatpush.msra.mxu2 %v56_v11 }
  0x1d   :  { %862 = vmatpush.msra.mxu1 %v851_v40  ;;  %1091 = vmatpush.msra.mxu3 %v851_v40 }
  0x1e   :  { %84 = vmatpush.msra.mxu0 %v55_v12  ;;  %1082 = vmatpush.msra.mxu2 %v55_v12 }
  0x1f   :  { %863 = vmatpush.msra.mxu1 %v850_v42  ;;  %1092 = vmatpush.msra.mxu3 %v850_v42 }
  0x20   :  { %85 = vmatpush.msra.mxu0 %v54_v13  ;;  %1083 = vmatpush.msra.mxu2 %v54_v13  ;;  %v843_v13 = vld [vmem:[#allocation3 + $0x10] sm:$0xff] }
  0x21   :  { %864 = vmatpush.msra.mxu1 %v849_v45  ;;  %1093 = vmatpush.msra.mxu3 %v849_v45 }
  0x22   :  { %86 = vmatpush.msra.mxu0 %v53_v14  ;;  %1084 = vmatpush.msra.mxu2 %v53_v14 }
  0x23   :  { %865 = vmatpush.msra.mxu1 %v848_v49  ;;  %1094 = vmatpush.msra.mxu3 %v848_v49 }
  0x24   :  { %87 = vmatpush.msra.mxu0 %v52_v15  ;;  %1085 = vmatpush.msra.mxu2 %v52_v15 }
  0x25   :  { %88 = vmatmul.f32.vlgmr.msra.gmra.mxu0 %v36_v16  ;;  %112 = vmatmul.f32.vlgmr.msra.gmra.mxu2 %v44_v17  ;;  %v842_v17 = vld [vmem:[#allocation3 + $0x8] sm:$0xff] }
  0x26   :  { %866 = vmatpush.msra.mxu1 %v847_v56  ;;  %1095 = vmatpush.msra.mxu3 %v847_v56 }
  0x28   :  { %867 = vmatpush.msra.mxu1 %v846_v60  ;;  %1096 = vmatpush.msra.mxu3 %v846_v60 }
  0x2a   :  { %868 = vmatpush.msra.mxu1 %v845_v3  ;;  %1097 = vmatpush.msra.mxu3 %v845_v3 }
  0x2c   :  { %869 = vmatpush.msra.mxu1 %v844_v7  ;;  %1098 = vmatpush.msra.mxu3 %v844_v7 }
  0x2d   :  { %91 = vmatmul.f32.gmra.mxu0 %v37_v18  ;;  %115 = vmatmul.f32.gmra.mxu2 %v45_v19 }
  0x2e   :  { %870 = vmatpush.msra.mxu1 %v843_v13  ;;  %1099 = vmatpush.msra.mxu3 %v843_v13 }
  0x30   :  { %871 = vmatpush.msra.mxu1 %v842_v17  ;;  %1100 = vmatpush.msra.mxu3 %v842_v17 }
  0x35   :  { %94 = vmatmul.f32.gmra.mxu0 %v38_v20  ;;  %118 = vmatmul.f32.gmra.mxu2 %v46_v21 }
  0x3d   :  { %97 = vmatmul.f32.gmra.mxu0 %v39_v22  ;;  %121 = vmatmul.f32.gmra.mxu2 %v47_v23 }
  0x45   :  { %100 = vmatmul.f32.gmra.mxu0 %v40_v24  ;;  %124 = vmatmul.f32.gmra.mxu2 %v48_v25  ;;  %v841_v25 = vld [vmem:[#allocation3] sm:$0xff] }
  0x46   :  { %872 = vmatpush.msra.mxu1 %v841_v25  ;;  %1101 = vmatpush.msra.mxu3 %v841_v25 }
  0x4d   :  { %103 = vmatmul.f32.gmra.mxu0 %v41_v26  ;;  %127 = vmatmul.f32.gmra.mxu2 %v49_v27 }
  0x55   :  { %106 = vmatmul.f32.gmra.mxu0 %v42_v28  ;;  %130 = vmatmul.f32.gmra.mxu2 %v50_v29 }
  0x5d   :  { %109 = vmatmul.f32.gmra.mxu0 %v43_v30  ;;  %133 = vmatmul.f32.gmra.mxu2 %v51_v31 }
  0xa2   :  { %v89_v37 = vpop.f32.mrf.mxu0 }
  0xa3   :  { %v1303_v39 = vadd.f32 %v1300_v35, %v89_v37 }
  0xa5   :  { %v1306_v41 = vmul.f32 0.70710677, %v1303_v39  ;;  %v1409_v13 = vmul.f32 0.5, %v1303_v39 }
  0xa7   :  { %v169_v43 = vmul.f32 %v1306_v41, %v1306_v41 }
  0xa8   :  { %v113_v44 = vpop.f32.mrf.mxu2 }
  0xa9   :  { %v1310_v46 = vmin.f32 %v169_v43, 16.0  ;;  %v1313_v47 = vadd.f32 %v1300_v35, %v113_v44 }
  0xaa   :  { %v92_v48 = vpop.f32.mrf.mxu0 }
  0xab   :  { %v1316_v50 = vmul.f32 0.70710677, %v1313_v47  ;;  %v1319_v51 = vadd.f32 %v1300_v35, %v92_v48  ;;  %v171_v52 = vmul.f32 2.1237322e-06, %v1310_v46  ;;  %v182_v53 = vmul.f32 3.8918573e-05, %v1310_v46 }
  0xad   :  { %v489_v54 = vmul.f32 %v1316_v50, %v1316_v50  ;;  %v1326_v55 = vmul.f32 0.70710677, %v1319_v51  ;;  %v183_v57 = vadd.f32 0.001143296, %v182_v53  ;;  %v172_v61 = vadd.f32 0.00028619796, %v171_v52 }
  0xaf   :  { %v1328_v58 = vmin.f32 %v489_v54, 16.0  ;;  %v209_v59 = vmul.f32 %v1326_v55, %v1326_v55  ;;  %v184_v63 = vmul.f32 %v183_v57, %v1310_v46  ;;  %v173_v8 = vmul.f32 %v172_v61, %v1310_v46 }
  0xb0   :  { %v116_v62 = vpop.f32.mrf.mxu2 }
  0xb1   :  { %v491_v0 = vmul.f32 2.1237322e-06, %v1328_v58  ;;  %v1334_v1 = vmin.f32 %v209_v59, 16.0  ;;  %v1337_v2 = vadd.f32 %v1300_v35, %v116_v62  ;;  %v185_v5 = vadd.f32 0.014752088, %v184_v63 }
  0xb2   :  { %v95_v4 = vpop.f32.mrf.mxu0  ;;  %v174_v19 = vadd.f32 0.0036580483, %v173_v8 }
  0xb3   :  { %v211_v6 = vmul.f32 2.1237322e-06, %v1334_v1  ;;  %v1342_v9 = vmul.f32 0.70710677, %v1337_v2  ;;  %v1345_v10 = vadd.f32 %v1300_v35, %v95_v4  ;;  %v186_v11 = vmul.f32 %v185_v5, %v1310_v46 }
  0xb4   :  { %v492_v12 = vadd.f32 0.00028619796, %v491_v0  ;;  %v175_v31 = vmul.f32 %v174_v19, %v1310_v46 }
  0xb5   :  { %v212_v14 = vadd.f32 0.00028619796, %v211_v6  ;;  %v529_v15 = vmul.f32 %v1342_v9, %v1342_v9  ;;  %v1351_v16 = vmul.f32 0.70710677, %v1345_v10  ;;  %v187_v18 = vadd.f32 0.112945676, %v186_v11 }
  0xb6   :  { %v493_v23 = vmul.f32 %v492_v12, %v1328_v58  ;;  %v176_v44 = vadd.f32 0.05243302, %v175_v31 }
  0xb7   :  { %v1353_v20 = vmin.f32 %v529_v15, 16.0  ;;  %v249_v21 = vmul.f32 %v1351_v16, %v1351_v16  ;;  %v213_v26 = vmul.f32 %v212_v14, %v1334_v1  ;;  %v188_v30 = vmul.f32 %v187_v18, %v1310_v46 }
  0xb8   :  { %v119_v22 = vpop.f32.mrf.mxu2  ;;  %v494_v34 = vadd.f32 0.0036580483, %v493_v23  ;;  %v177_v61 = vmul.f32 %v176_v44, %v1310_v46  ;;  %v1421_v23 = vmul.f32 0.5, %v1313_v47  ;;  %v1436_v47 = vmul.f32 0.5, %v1337_v2 }
  0xb9   :  { %v1359_v24 = vadd.f32 %v1300_v35, %v119_v22  ;;  %v531_v27 = vmul.f32 2.1237322e-06, %v1353_v20  ;;  %v1363_v29 = vmin.f32 %v249_v21, 16.0  ;;  %v214_v36 = vadd.f32 0.0036580483, %v213_v26 }
  0xba   :  { %v98_v28 = vpop.f32.mrf.mxu0  ;;  %v189_v43 = vadd.f32 0.4994258, %v188_v30  ;;  %v495_v48 = vmul.f32 %v494_v34, %v1328_v58  ;;  %v178_v14 = vadd.f32 0.18741608, %v177_v61 }
  0xbb   :  { %v1368_v32 = vmul.f32 0.70710677, %v1359_v24  ;;  %v1371_v33 = vadd.f32 %v1300_v35, %v98_v28  ;;  %v532_v37 = vadd.f32 0.00028619796, %v531_v27  ;;  %v251_v40 = vmul.f32 2.1237322e-06, %v1363_v29 }
  0xbc   :  { %v215_v53 = vmul.f32 %v214_v36, %v1334_v1  ;;  %v190_v60 = vmul.f32 %v189_v43, %v1310_v46  ;;  %v496_v0 = vadd.f32 0.05243302, %v495_v48  ;;  %v179_v34 = vmul.f32 %v178_v14, %v1310_v46 }
  0xbd   :  { %v569_v38 = vmul.f32 %v1368_v32, %v1368_v32  ;;  %v1377_v42 = vmul.f32 0.70710677, %v1371_v33  ;;  %v533_v54 = vmul.f32 %v532_v37, %v1353_v20  ;;  %v252_v59 = vadd.f32 0.00028619796, %v251_v40 }
  0xbe   :  { %v216_v4 = vadd.f32 0.05243302, %v215_v53  ;;  %v1406_v12 = vadd.f32 1.0, %v190_v60  ;;  %v497_v18 = vmul.f32 %v496_v0, %v1328_v58  ;;  %v1433_v36 = vmul.f32 0.5, %v1319_v51 }
  0xbf   :  { %v289_v49 = vmul.f32 %v1377_v42, %v1377_v42  ;;  %v1387_v56 = vmin.f32 %v569_v38, 16.0  ;;  %v534_v5 = vadd.f32 0.0036580483, %v533_v54  ;;  %v253_v8 = vmul.f32 %v252_v59, %v1363_v29 }
  0xc0   :  { %v122_v45 = vpop.f32.mrf.mxu2  ;;  %v217_v39 = vmul.f32 %v216_v4, %v1334_v1  ;;  %1107 = vrcp.f32 %v1406_v12  ;;  %v498_v38 = vadd.f32 0.18741608, %v497_v18  ;;  %v1445_v48 = vmul.f32 0.5, %v1345_v10 }
  0xc1   :  { %v1383_v52 = vadd.f32 %v1300_v35, %v122_v45  ;;  %v1391_v62 = vmin.f32 %v289_v49, 16.0  ;;  %v571_v6 = vmul.f32 2.1237322e-06, %v1387_v56  ;;  %v535_v25 = vmul.f32 %v534_v5, %v1353_v20 }
  0xc2   :  { %v101_v57 = vpop.f32.mrf.mxu0  ;;  %v254_v28 = vadd.f32 0.0036580483, %v253_v8  ;;  %v218_v45 = vadd.f32 0.18741608, %v217_v39  ;;  %v1449_v51 = vmul.f32 3.8918573e-05, %v1328_v58  ;;  %v499_v4 = vmul.f32 %v498_v38, %v1328_v58 }
  0xc3   :  { %v1394_v63 = vmul.f32 0.70710677, %v1383_v52  ;;  %v1397_v3 = vadd.f32 %v1300_v35, %v101_v57  ;;  %v291_v15 = vmul.f32 2.1237322e-06, %v1391_v62  ;;  %v572_v26 = vadd.f32 0.00028619796, %v571_v6 }
  0xc4   :  { %v536_v2 = vadd.f32 0.05243302, %v535_v25  ;;  %v255_v49 = vmul.f32 %v254_v28, %v1363_v29  ;;  %v180_v57 = vadd.f32 1.1283791, %v179_v34  ;;  %v1456_v59 = vmul.f32 0.5, %v1359_v24 }
  0xc5   :  { %v609_v7 = vmul.f32 %v1394_v63, %v1394_v63  ;;  %v1404_v11 = vmul.f32 0.70710677, %v1397_v3  ;;  %v292_v37 = vadd.f32 0.00028619796, %v291_v15  ;;  %v573_v46 = vmul.f32 %v572_v26, %v1387_v56 }
  0xc6   :  { %v1462_v0 = vpop.eup %1107  ;;  %v219_v8 = vmul.f32 %v218_v45, %v1334_v1  ;;  %v1471_v14 = vmul.f32 0.5, %v1371_v33  ;;  %v537_v18 = vmul.f32 %v536_v2, %v1353_v20  ;;  %v1484_v33 = vmul.f32 %v180_v57, %v1306_v41 }
  0xc7   :  { %v1413_v19 = vmin.f32 %v609_v7, 16.0  ;;  %v329_v21 = vmul.f32 %v1404_v11, %v1404_v11  ;;  %v293_v60 = vmul.f32 %v292_v37, %v1391_v62  ;;  %v574_v24 = vadd.f32 0.0036580483, %v573_v46 }
  0xc8   :  { %v125_v17 = vpop.f32.mrf.mxu2  ;;  %v193_v34 = vmul.f32 %v1462_v0, %v1406_v12  ;;  %v500_v37 = vadd.f32 1.1283791, %v499_v4  ;;  %v1492_v46 = vmul.f32 0.5, %v1383_v52  ;;  %vm198_vm0 = vweird.f32 %v1462_v0 }
  0xc9   :  { %v1418_v22 = vadd.f32 %v1300_v35, %v125_v17  ;;  %v1425_v30 = vmin.f32 %v329_v21, 16.0  ;;  %v611_v40 = vmul.f32 2.1237322e-06, %v1413_v19  ;;  %v256_v21 = vadd.f32 0.05243302, %v255_v49 }
  0xca   :  { %v104_v27 = vpop.f32.mrf.mxu0  ;;  %v294_v26 = vadd.f32 0.0036580483, %v293_v60  ;;  %v575_v45 = vmul.f32 %v574_v24, %v1387_v56  ;;  %v538_v49 = vadd.f32 0.18741608, %v537_v18  ;;  %v194_v52 = vsub.f32 1.0, %v193_v34 }
  0xcb   :  { %v1428_v31 = vmul.f32 0.70710677, %v1418_v22  ;;  %v1442_v44 = vadd.f32 %v1300_v35, %v104_v27  ;;  %v331_v53 = vmul.f32 2.1237322e-06, %v1425_v30  ;;  %v612_v5 = vadd.f32 0.00028619796, %v611_v40 }
  0xcc   :  { %v257_v60 = vmul.f32 %v256_v21, %v1363_v29  ;;  %v576_v18 = vadd.f32 0.05243302, %v575_v45  ;;  %vm197_vm1 = vweird.f32 %v1406_v12 }
  0xcd   :  { %v649_v43 = vmul.f32 %v1428_v31, %v1428_v31  ;;  %v1460_v10 = vmul.f32 0.70710677, %v1442_v44  ;;  %v332_v39 = vadd.f32 0.00028619796, %v331_v53  ;;  %v613_v38 = vmul.f32 %v612_v5, %v1413_v19  ;;  %vm1549_vm2 = vmor %vm197_vm1, %vm198_vm0 }
  0xcf   :  { %v1453_v54 = vmin.f32 %v649_v43, 16.0  ;;  %v369_v15 = vmul.f32 %v1460_v10, %v1460_v10  ;;  %v220_v43 = vadd.f32 1.1283791, %v219_v8  ;;  %v333_v53 = vmul.f32 %v332_v39, %v1425_v30 }
  0xd0   :  { %v128_v61 = vpop.f32.mrf.mxu2  ;;  %v614_v8 = vadd.f32 0.0036580483, %v613_v38 }
  0xd1   :  { %v651_v6 = vmul.f32 2.1237322e-06, %v1453_v54  ;;  %v1467_v7 = vadd.f32 %v1300_v35, %v128_v61  ;;  %v1476_v27 = vmin.f32 %v369_v15, 16.0  ;;  %v295_v61 = vmul.f32 %v294_v26, %v1391_v62 }
  0xd2   :  { %v107_v17 = vpop.f32.mrf.mxu0  ;;  %v334_v26 = vadd.f32 0.0036580483, %v333_v53  ;;  %v1529_v53 = vmul.f32 0.5, %v1397_v3 }
  0xd3   :  { %v652_v25 = vadd.f32 0.00028619796, %v651_v6  ;;  %v1479_v28 = vadd.f32 %v1300_v35, %v107_v17  ;;  %v1488_v40 = vmul.f32 0.70710677, %v1467_v7  ;;  %v371_v2 = vmul.f32 2.1237322e-06, %v1476_v27 }
  0xd4   :  { %v1505_v6 = vmul.f32 %v500_v37, %v1316_v50  ;;  %v1510_v17 = vmul.f32 %v220_v43, %v1326_v55  ;;  %v258_v37 = vadd.f32 0.18741608, %v257_v60  ;;  %v296_v38 = vadd.f32 0.05243302, %v295_v61 }
  0xd5   :  { %2005 = vst [vmem:[#allocation6_spill] sm:$0xff] %v1479_v28  ;;  %v653_v41 = vmul.f32 %v652_v25, %v1453_v54  ;;  %v689_v57 = vmul.f32 %v1488_v40, %v1488_v40  ;;  %v1502_v4 = vmul.f32 0.70710677, %v1479_v28  ;;  %v372_v24 = vadd.f32 0.00028619796, %v371_v2 }
  0xd6   :  { %v539_v25 = vmul.f32 %v538_v49, %v1353_v20  ;;  %v195_v55 = vmul.f32 %v1462_v0, %v194_v52  ;;  %v615_v43 = vmul.f32 %v614_v8, %v1413_v19  ;;  %v577_v49 = vmul.f32 %v576_v18, %v1387_v56 }
  0xd7   :  { %v1507_v15 = vmin.f32 %v689_v57, 16.0  ;;  %v409_v21 = vmul.f32 %v1502_v4, %v1502_v4  ;;  %v654_v34 = vadd.f32 0.0036580483, %v653_v41  ;;  %v373_v45 = vmul.f32 %v372_v24, %v1476_v27 }
  0xd8   :  { %v131_v5 = vpop.f32.mrf.mxu2  ;;  %v1532_v41 = vmul.f32 0.5, %v1418_v22  ;;  %v540_v61 = vadd.f32 1.1283791, %v539_v25  ;;  %v335_v52 = vmul.f32 %v334_v26, %v1425_v30  ;;  %v196_v18 = vadd.f32 %v1462_v0, %v195_v55 }
  0xd9   :  { %v1515_v39 = vadd.f32 %v1300_v35, %v131_v5  ;;  %v691_v50 = vmul.f32 2.1237322e-06, %v1507_v15  ;;  %v1519_v2 = vmin.f32 %v409_v21, 16.0  ;;  %v655_v8 = vmul.f32 %v654_v34, %v1453_v54 }
  0xda   :  { %2008 = vst [vmem:[#allocation9_spill] sm:$0xff] %v1532_v41  ;;  %v259_v3 = vmul.f32 %v258_v37, %v1363_v29  ;;  %v297_v22 = vmul.f32 %v296_v38, %v1391_v62  ;;  %v374_v25 = vadd.f32 0.0036580483, %v373_v45  ;;  %v578_v28 = vadd.f32 0.18741608, %v577_v49 }
  0xdb   :  { %2006 = vst [vmem:[#allocation7_spill] sm:$0xff] %v1515_v39  ;;  %v692_v57 = vadd.f32 0.00028619796, %v691_v50  ;;  %v1525_v5 = vmul.f32 0.70710677, %v1515_v39  ;;  %v203_v37 = vand.u32 2147483648, %v1406_v12  ;;  %v200_v45 = vsel %vm1549_vm2, %v1462_v0, %v196_v18  ;;  %v110_v0 = vpop.f32.mrf.mxu0 }
  0xdc   :  { %v411_v60 = vmul.f32 2.1237322e-06, %v1519_v2  ;;  %v616_v39 = vadd.f32 0.05243302, %v615_v43  ;;  %v201_v34 = vand.u32 2147483647, %v1406_v12  ;;  %v579_v41 = vmul.f32 %v578_v28, %v1387_v56 }
  0xdd   :  { %2007 = vst [vmem:[#allocation8_spill] sm:$0xff] %v1525_v5  ;;  %v693_v24 = vmul.f32 %v692_v57, %v1507_v15  ;;  %v729_v50 = vmul.f32 %v1525_v5, %v1525_v5  ;;  %v1547_v57 = vmul.f32 %v540_v61, %v1342_v9  ;;  %v656_v5 = vadd.f32 0.05243302, %v655_v8 }
  0xde   :  { %v412_v21 = vadd.f32 0.00028619796, %v411_v60  ;;  %v336_v60 = vadd.f32 0.05243302, %v335_v52  ;;  %v503_v49 = vadd.f32 0.001143296, %v1449_v51  ;;  %v617_v61 = vmul.f32 %v616_v39, %v1413_v19 }
  0xdf   :  { %v694_v26 = vadd.f32 0.0036580483, %v693_v24  ;;  %v1555_v43 = vmin.f32 %v729_v50, 16.0  ;;  %v298_v9 = vadd.f32 0.18741608, %v297_v22  ;;  %v375_v52 = vmul.f32 %v374_v25, %v1476_v27 }
  0xe0   :  { %v413_v38 = vmul.f32 %v412_v21, %v1519_v2  ;;  %v204_v8 = vor.u32 1.1754944e-38, %v203_v37  ;;  %v260_v24 = vadd.f32 1.1283791, %v259_v3  ;;  %vm202_vm3 = vcmp.eq.f32.partialorder %v201_v34, 8.507059e+37 }
  0xe1   :  { %v695_v12 = vmul.f32 %v694_v26, %v1507_v15  ;;  %v337_v21 = vmul.f32 %v336_v60, %v1425_v30  ;;  %v657_v50 = vmul.f32 %v656_v5, %v1453_v54  ;;  %v504_v51 = vmul.f32 %v503_v49, %v1328_v58 }
  0xe2   :  { %v205_v55 = vsel %vm202_vm3, %v204_v8, %v200_v45  ;;  %v1569_v18 = vmul.f32 0.5, %v1442_v44  ;;  %v414_v39 = vadd.f32 0.0036580483, %v413_v38  ;;  %v731_v22 = vmul.f32 2.1237322e-06, %v1555_v43 }
  0xe3   :  { %v206_v3 = vmul.f32 %v205_v55, %v1484_v33  ;;  %v299_v28 = vmul.f32 %v298_v9, %v1391_v62  ;;  %v618_v25 = vadd.f32 0.18741608, %v617_v61  ;;  %v376_v26 = vadd.f32 0.05243302, %v375_v52 }
  0xe4   :  { %2011 = vst [vmem:[#allocation10_spill] sm:$0xff] %v1569_v18  ;;  %v505_v34 = vadd.f32 0.014752088, %v504_v51  ;;  %v580_v60 = vadd.f32 1.1283791, %v579_v41  ;;  %v1575_v45 = vadd.f32 %v1300_v35, %v110_v0  ;;  %v1580_v18 = vmul.f32 0.5, %v1467_v7 }
  0xe5   :  { %v696_v37 = vadd.f32 0.05243302, %v695_v12  ;;  %v1054_v5 = vclamps-f32 %v206_v3, 1.0  ;;  %v338_v49 = vadd.f32 0.18741608, %v337_v21  ;;  %v415_v33 = vmul.f32 %v414_v39, %v1519_v2 }
  0xe6   :  { %2012 = vst [vmem:[#allocation11_spill] sm:$0xff] %v1575_v45  ;;  %v658_v8 = vadd.f32 0.18741608, %v657_v50  ;;  %v506_v44 = vmul.f32 %v505_v34, %v1328_v58  ;;  %v222_v38 = vmul.f32 3.8918573e-05, %v1334_v1  ;;  %v619_v41 = vmul.f32 %v618_v25, %v1413_v19 }
  0xe7   :  { %v732_v9 = vadd.f32 0.00028619796, %v731_v22  ;;  %v809_v61 = vadd.f32 1.0, %v1054_v5  ;;  %v300_v52 = vadd.f32 1.1283791, %v299_v28  ;;  %v377_v12 = vmul.f32 %v376_v26, %v1476_v27 }
  0xe8   :  { %v507_v55 = vadd.f32 0.112945676, %v506_v44  ;;  %v697_v21 = vmul.f32 %v696_v37, %v1507_v15  ;;  %v1588_v0 = vmul.f32 0.70710677, %v1575_v45  ;;  %v223_v51 = vadd.f32 0.001143296, %v222_v38 }
  0xe9   :  { %v825_v50 = vmul.f32 %v809_v61, %v1409_v13  ;;  %v339_v7 = vmul.f32 %v338_v49, %v1425_v30  ;;  %v659_v39 = vmul.f32 %v658_v8, %v1453_v54  ;;  %v542_v3 = vmul.f32 3.8918573e-05, %v1353_v20 }
  0xea   :  { %v508_v22 = vmul.f32 %v507_v55, %v1328_v58  ;;  %v416_v28 = vadd.f32 0.05243302, %v415_v33  ;;  %v733_v25 = vmul.f32 %v732_v9, %v1555_v43  ;;  %v224_v26 = vmul.f32 %v223_v51, %v1334_v1 }
  0xeb   :  { %873 = vmatmul.f32.vlgmr.msra.gmra.mxu1 %v825_v50  ;;  %v262_v13 = vmul.f32 3.8918573e-05, %v1363_v29  ;;  %v1598_v34 = vmul.f32 %v260_v24, %v1351_v16  ;;  %v378_v37 = vadd.f32 0.18741608, %v377_v12  ;;  %v543_v49 = vadd.f32 0.001143296, %v542_v3 }
  0xec   :  { %v509_v5 = vadd.f32 0.4994258, %v508_v22  ;;  %v698_v44 = vadd.f32 0.18741608, %v697_v21  ;;  %v449_v8 = vmul.f32 %v1588_v0, %v1588_v0  ;;  %v225_v38 = vadd.f32 0.014752088, %v224_v26  ;;  %v134_v22 = vpop.f32.mrf.mxu2 }
  0xed   :  { %v263_v61 = vadd.f32 0.001143296, %v262_v13  ;;  %v620_v33 = vadd.f32 1.1283791, %v619_v41  ;;  %v340_v55 = vadd.f32 1.1283791, %v339_v7  ;;  %v417_v51 = vmul.f32 %v416_v28, %v1519_v2 }
  0xee   :  { %v660_v9 = vadd.f32 1.1283791, %v659_v39  ;;  %v510_v50 = vmul.f32 %v509_v5, %v1328_v58  ;;  %v734_v45 = vadd.f32 0.0036580483, %v733_v25  ;;  %v226_v16 = vmul.f32 %v225_v38, %v1334_v1 }
  0xef   :  { %v544_v24 = vmul.f32 %v543_v49, %v1353_v20  ;;  %v379_v12 = vmul.f32 %v378_v37, %v1476_v27  ;;  %v264_v3 = vmul.f32 %v263_v61, %v1363_v29  ;;  %v582_v41 = vmul.f32 3.8918573e-05, %v1387_v56 }
  0xf0   :  { %v1607_v21 = vadd.f32 1.0, %v510_v50  ;;  %v699_v7 = vmul.f32 %v698_v44, %v1507_v15  ;;  %v1612_v39 = vmin.f32 %v449_v8, 16.0  ;;  %v227_v58 = vadd.f32 0.112945676, %v226_v16 }
  0xf1   :  { %v545_v28 = vadd.f32 0.014752088, %v544_v24  ;;  %v1615_v25 = vmul.f32 %v580_v60, %v1368_v32  ;;  %v1618_v26 = vmul.f32 %v300_v52, %v1377_v42  ;;  %v1621_v13 = vmul.f32 %v620_v33, %v1394_v63 }
  0xf2   :  { %1109 = vrcp.f32 %v1607_v21  ;;  %v418_v37 = vadd.f32 0.18741608, %v417_v51  ;;  %v735_v5 = vmul.f32 %v734_v45, %v1555_v43  ;;  %v1626_v49 = vadd.f32 %v1300_v35, %v134_v22 }
  0xf3   :  { %v228_v44 = vmul.f32 %v227_v58, %v1334_v1  ;;  %v1630_v8 = vmul.f32 %v340_v55, %v1404_v11  ;;  %v546_v32 = vmul.f32 %v545_v28, %v1353_v20  ;;  %v265_v42 = vadd.f32 0.014752088, %v264_v3 }
  0xf4   :  { %2013 = vst [vmem:[#allocation12_spill] sm:$0xff] %v1626_v49  ;;  %v583_v60 = vadd.f32 0.001143296, %v582_v41  ;;  %v1634_v63 = vmul.f32 %v660_v9, %v1428_v31  ;;  %v380_v52 = vadd.f32 1.1283791, %v379_v12  ;;  %v419_v11 = vmul.f32 %v418_v37, %v1519_v2 }
  0xf5   :  { %v700_v38 = vadd.f32 1.1283791, %v699_v7  ;;  %v451_v61 = vmul.f32 2.1237322e-06, %v1612_v39  ;;  %v229_v45 = vadd.f32 0.4994258, %v228_v44  ;;  %v266_v35 = vmul.f32 %v265_v42, %v1363_v29 }
  0xf6   :  { %v547_v33 = vadd.f32 0.112945676, %v546_v32  ;;  %v584_v50 = vmul.f32 %v583_v60, %v1387_v56  ;;  %v736_v55 = vadd.f32 0.05243302, %v735_v5  ;;  %v1641_v51 = vmul.f32 0.70710677, %v1626_v49 }
  0xf7   :  { %v302_v16 = vmul.f32 3.8918573e-05, %v1391_v62  ;;  %v230_v9 = vmul.f32 %v229_v45, %v1334_v1  ;;  %v267_v12 = vadd.f32 0.112945676, %v266_v35  ;;  %v1647_v3 = vmul.f32 %v380_v52, %v1460_v10 }
  0xf8   :  { %2014 = vst [vmem:[#allocation13_spill] sm:$0xff] %v1641_v51  ;;  %v1110_v31 = vpop.eup %1109  ;;  %v548_v24 = vmul.f32 %v547_v33, %v1353_v20  ;;  %v585_v22 = vadd.f32 0.014752088, %v584_v50  ;;  %v1650_v41 = vmul.f32 %v700_v38, %v1488_v40  ;;  %v452_v7 = vadd.f32 0.00028619796, %v451_v61 }
  0xf9   :  { %v513_v58 = vmul.f32 %v1110_v31, %v1607_v21  ;;  %v1653_v28 = vadd.f32 1.0, %v230_v9  ;;  %v268_v5 = vmul.f32 %v267_v12, %v1363_v29  ;;  %v1657_v44 = vadd.f32 1.1283791, %v419_v11 }
  0xfa   :  { %v549_v37 = vadd.f32 0.4994258, %v548_v24  ;;  %v586_v1 = vmul.f32 %v585_v22, %v1387_v56  ;;  %v737_v32 = vmul.f32 %v736_v55, %v1555_v43  ;;  %v303_v10 = vadd.f32 0.001143296, %v302_v16 }
  0xfb   :  { %v514_v42 = vsub.f32 1.0, %v513_v58  ;;  %v521_v60 = vand.u32 2147483647, %v1607_v21  ;;  %v523_v40 = vand.u32 2147483648, %v1607_v21  ;;  %v769_v52 = vmul.f32 %v1641_v51, %v1641_v51 }
  0xfc   :  { %1111 = vrcp.f32 %v1653_v28  ;;  %vm518_vm4 = vweird.f32 %v1110_v31  ;;  %v550_v61 = vmul.f32 %v549_v37, %v1353_v20  ;;  %v269_v45 = vadd.f32 0.4994258, %v268_v5 }
  0xfd   :  { %v515_v38 = vmul.f32 %v1110_v31, %v514_v42  ;;  %v453_v33 = vmul.f32 %v452_v7, %v1612_v39  ;;  %v587_v35 = vadd.f32 0.112945676, %v586_v1  ;;  %v304_v50 = vmul.f32 %v303_v10, %v1391_v62 }
  0xfe   :  { %v622_v11 = vmul.f32 3.8918573e-05, %v1413_v19  ;;  %vm517_vm5 = vweird.f32 %v1607_v21  ;;  %v1670_v16 = vadd.f32 1.0, %v550_v61  ;;  %v270_v9 = vmul.f32 %v269_v45, %v1363_v29 }
  0xff   :  { %v516_v55 = vadd.f32 %v1110_v31, %v515_v38  ;;  %v1673_v24 = vadd.f32 0.18741608, %v737_v32  ;;  %vm519_vm6 = vmor %vm517_vm5, %vm518_vm4  ;;  %vm522_vm7 = vcmp.eq.f32.partialorder %v521_v60, 8.507059e+37  ;;  %v524_v20 = vor.u32 1.1754944e-38, %v523_v40 }
 0x100   :  { %v1675_v12 = vmin.f32 %v769_v52, 16.0  ;;  %v241_v7 = vand.u32 2147483647, %v1653_v28  ;;  %1113 = vrcp.f32 %v1670_v16  ;;  %v588_v58 = vmul.f32 %v587_v35, %v1387_v56 }
 0x101   :  { %v520_v22 = vsel %vm519_vm6, %v1110_v31, %v516_v55  ;;  %v1680_v5 = vadd.f32 1.0, %v270_v9  ;;  %v305_v1 = vadd.f32 0.014752088, %v304_v50  ;;  %v623_v29 = vadd.f32 0.001143296, %v622_v11 }
 0x102   :  { %v1112_v37 = vpop.eup %1111  ;;  %v525_v21 = vsel %vm522_vm7, %v524_v20, %v520_v22  ;;  %v1682_v32 = vadd.f32 0.0036580483, %v453_v33  ;;  %v243_v31 = vand.u32 2147483648, %v1653_v28  ;;  %v1688_v60 = vmul.f32 2.1237322e-06, %v1675_v12 }
 0x103   :  { %v526_v42 = vmul.f32 %v525_v21, %v1505_v6  ;;  %v233_v10 = vmul.f32 %v1112_v37, %v1653_v28  ;;  %vm237_vm8 = vweird.f32 %v1653_v28  ;;  %v561_v40 = vand.u32 2147483647, %v1670_v16 }
 0x104   :  { %1115 = vrcp.f32 %v1680_v5  ;;  %vm1693_vm9 = vcmp.eq.f32.partialorder %v241_v7, 8.507059e+37  ;;  %v563_v6 = vand.u32 2147483648, %v1670_v16  ;;  %v589_v45 = vadd.f32 0.4994258, %v588_v58 }
 0x105   :  { %v1062_v52 = vclamps-f32 %v526_v42, 1.0  ;;  %v234_v38 = vsub.f32 1.0, %v233_v10  ;;  %v306_v33 = vmul.f32 %v305_v1, %v1391_v62  ;;  %v624_v35 = vmul.f32 %v623_v29, %v1413_v19 }
 0x106   :  { %v342_v50 = vmul.f32 3.8918573e-05, %v1425_v30  ;;  %v1114_v11 = vpop.eup %1113  ;;  %vm238_vm10 = vweird.f32 %v1112_v37  ;;  %v244_v20 = vor.u32 1.1754944e-38, %v243_v31  ;;  %vm557_vm11 = vweird.f32 %v1670_v16 }
 0x107   :  { %v817_v55 = vadd.f32 1.0, %v1062_v52  ;;  %v235_v9 = vmul.f32 %v1112_v37, %v234_v38  ;;  %v553_v22 = vmul.f32 %v1114_v11, %v1670_v16  ;;  %vm1703_vm12 = vcmp.eq.f32.partialorder %v561_v40, 8.507059e+37  ;;  %vm239_vm13 = vmor %vm237_vm8, %vm238_vm10 }
 0x108   :  { %v590_v58 = vmul.f32 %v589_v45, %v1387_v56  ;;  %v564_v29 = vor.u32 1.1754944e-38, %v563_v6  ;;  %v307_v42 = vadd.f32 0.112945676, %v306_v33  ;;  %v625_v38 = vadd.f32 0.014752088, %v624_v35 }
 0x109   :  { %v833_v21 = vmul.f32 %v817_v55, %v1421_v23  ;;  %v236_v1 = vadd.f32 %v1112_v37, %v235_v9  ;;  %v554_v31 = vsub.f32 1.0, %v553_v22  ;;  %v343_v49 = vadd.f32 0.001143296, %v342_v50 }
 0x10a   :  { %v1116_v10 = vpop.eup %1115  ;;  %v1711_v52 = vadd.f32 1.0, %v590_v58  ;;  %v281_v56 = vand.u32 2147483647, %v1680_v5  ;;  %v308_v23 = vmul.f32 %v307_v42, %v1391_v62  ;;  %vm558_vm14 = vweird.f32 %v1114_v11 }
 0x10b   :  { %897 = vmatmul.f32.vlgmr.msra.gmra.mxu3 %v833_v21  ;;  %v240_v40 = vsel %vm239_vm13, %v1112_v37, %v236_v1  ;;  %v273_v51 = vmul.f32 %v1116_v10, %v1680_v5  ;;  %v555_v45 = vmul.f32 %v1114_v11, %v554_v31  ;;  %vm277_vm15 = vweird.f32 %v1680_v5  ;;  %vm559_vm0 = vmor %vm557_vm11, %vm558_vm14 }
 0x10c   :  { %v245_v6 = vsel %vm1693_vm9, %v244_v20, %v240_v40  ;;  %1117 = vrcp.f32 %v1711_v52  ;;  %v283_v37 = vand.u32 2147483648, %v1680_v5  ;;  %v309_v50 = vadd.f32 0.4994258, %v308_v23 }
 0x10d   :  { %v246_v28 = vmul.f32 %v245_v6, %v1510_v17  ;;  %v274_v33 = vsub.f32 1.0, %v273_v51  ;;  %v556_v35 = vadd.f32 %v1114_v11, %v555_v45  ;;  %v626_v55 = vmul.f32 %v625_v38, %v1413_v19 }
 0x10e   :  { %v344_v9 = vmul.f32 %v343_v49, %v1425_v30  ;;  %vm278_vm1 = vweird.f32 %v1116_v10  ;;  %vm1726_vm2 = vcmp.eq.f32.partialorder %v281_v56, 8.507059e+37  ;;  %v310_v51 = vmul.f32 %v309_v50, %v1391_v62 }
 0x10f   :  { %v1055_v22 = vclamps-f32 %v246_v28, 1.0  ;;  %v275_v61 = vmul.f32 %v1116_v10, %v274_v33  ;;  %v560_v17 = vsel %vm559_vm0, %v1114_v11, %v556_v35  ;;  %v627_v58 = vadd.f32 0.112945676, %v626_v55  ;;  %vm279_vm3 = vmor %vm277_vm15, %vm278_vm1 }
 0x110   :  { %v345_v21 = vadd.f32 0.014752088, %v344_v9  ;;  %v565_v42 = vsel %vm1703_vm12, %v564_v29, %v560_v17  ;;  %v284_v31 = vor.u32 1.1754944e-38, %v283_v37  ;;  %v1736_v40 = vadd.f32 1.0, %v310_v51 }
 0x111   :  { %v810_v1 = vadd.f32 1.0, %v1055_v22  ;;  %v276_v49 = vadd.f32 %v1116_v10, %v275_v61  ;;  %v566_v16 = vmul.f32 %v565_v42, %v1547_v57  ;;  %v628_v11 = vmul.f32 %v627_v58, %v1413_v19 }
 0x112   :  { %v1118_v38 = vpop.eup %1117  ;;  %v346_v62 = vmul.f32 %v345_v21, %v1425_v30  ;;  %v601_v29 = vand.u32 2147483647, %v1711_v52  ;;  %1119 = vrcp.f32 %v1736_v40  ;;  %v662_v5 = vmul.f32 3.8918573e-05, %v1453_v54 }
 0x113   :  { %v826_v56 = vmul.f32 %v810_v1, %v1433_v36  ;;  %v280_v23 = vsel %vm279_vm3, %v1116_v10, %v276_v49  ;;  %v593_v7 = vmul.f32 %v1118_v38, %v1711_v52  ;;  %v1063_v6 = vclamps-f32 %v566_v16, 1.0 }
 0x114   :  { %v285_v57 = vsel %vm1726_vm2, %v284_v31, %v280_v23  ;;  %v1748_v45 = vadd.f32 0.00028619796, %v1688_v60  ;;  %v603_v10 = vand.u32 2147483648, %v1711_v52  ;;  %vm597_vm4 = vweird.f32 %v1711_v52 }
 0x115   :  { %876 = vmatmul.f32.gmra.mxu1 %v826_v56  ;;  %v286_v28 = vmul.f32 %v285_v57, %v1598_v34  ;;  %v594_v36 = vsub.f32 1.0, %v593_v7  ;;  %v818_v33 = vadd.f32 1.0, %v1063_v6  ;;  %v629_v37 = vadd.f32 0.4994258, %v628_v11 }
 0x116   :  { %v347_v35 = vadd.f32 0.112945676, %v346_v62  ;;  %vm598_vm5 = vweird.f32 %v1118_v38  ;;  %vm1753_vm6 = vcmp.eq.f32.partialorder %v601_v29, 8.507059e+37  ;;  %v663_v61 = vadd.f32 0.001143296, %v662_v5 }
 0x117   :  { %v1056_v50 = vclamps-f32 %v286_v28, 1.0  ;;  %v595_v55 = vmul.f32 %v1118_v38, %v594_v36  ;;  %v834_v60 = vmul.f32 %v818_v33, %v1436_v47  ;;  %v630_v22 = vmul.f32 %v629_v37, %v1413_v19  ;;  %vm599_vm7 = vmor %vm597_vm4, %vm598_vm5 }
 0x118   :  { %v348_v34 = vmul.f32 %v347_v35, %v1425_v30  ;;  %v604_v51 = vor.u32 1.1754944e-38, %v603_v10  ;;  %v321_v58 = vand.u32 2147483647, %v1736_v40  ;;  %v1120_v21 = vpop.eup %1119  ;;  %v664_v47 = vmul.f32 %v663_v61, %v1453_v54 }
 0x119   :  { %v811_v20 = vadd.f32 1.0, %v1056_v50  ;;  %v596_v17 = vadd.f32 %v1118_v38, %v595_v55  ;;  %900 = vmatmul.f32.gmra.mxu3 %v834_v60  ;;  %v1763_v1 = vadd.f32 1.0, %v630_v22  ;;  %v382_v19 = vmul.f32 3.8918573e-05, %v1476_v27 }
 0x11a   :  { %v349_v42 = vadd.f32 0.4994258, %v348_v34  ;;  %v313_v16 = vmul.f32 %v1120_v21, %v1736_v40  ;;  %vm317_vm8 = vweird.f32 %v1736_v40  ;;  %v323_v52 = vand.u32 2147483648, %v1736_v40 }
 0x11b   :  { %v827_v49 = vmul.f32 %v811_v20, %v1445_v48  ;;  %v600_v31 = vsel %vm599_vm7, %v1118_v38, %v596_v17  ;;  %1121 = vrcp.f32 %v1763_v1  ;;  %v702_v62 = vmul.f32 3.8918573e-05, %v1507_v15 }
 0x11c   :  { %v605_v11 = vsel %vm1753_vm6, %v604_v51, %v600_v31  ;;  %v314_v23 = vsub.f32 1.0, %v313_v16  ;;  %vm1776_vm9 = vcmp.eq.f32.partialorder %v321_v58, 8.507059e+37  ;;  %v350_v38 = vmul.f32 %v349_v42, %v1425_v30 }
 0x11d   :  { %879 = vmatmul.f32.gmra.mxu1 %v827_v49  ;;  %v606_v56 = vmul.f32 %v605_v11, %v1615_v25  ;;  %vm318_vm10 = vweird.f32 %v1120_v21  ;;  %v665_v7 = vadd.f32 0.014752088, %v664_v47  ;;  %v383_v29 = vadd.f32 0.001143296, %v382_v19 }
 0x11e   :  { %v422_v6 = vmul.f32 3.8918573e-05, %v1519_v2  ;;  %v315_v5 = vmul.f32 %v1120_v21, %v314_v23  ;;  %v641_v28 = vand.u32 2147483647, %v1763_v1  ;;  %v1783_v36 = vadd.f32 1.0, %v350_v38  ;;  %vm319_vm11 = vmor %vm317_vm8, %vm318_vm10 }
 0x11f   :  { %v1064_v57 = vclamps-f32 %v606_v56, 1.0  ;;  %v324_v10 = vor.u32 1.1754944e-38, %v323_v52  ;;  %v643_v25 = vand.u32 2147483648, %v1763_v1  ;;  %v666_v33 = vmul.f32 %v665_v7, %v1453_v54 }
 0x120   :  { %v703_v37 = vadd.f32 0.001143296, %v702_v62  ;;  %v316_v50 = vadd.f32 %v1120_v21, %v315_v5  ;;  %1123 = vrcp.f32 %v1783_v36  ;;  %v384_v30 = vmul.f32 %v383_v29, %v1476_v27 }
 0x121   :  { %v819_v35 = vadd.f32 1.0, %v1064_v57  ;;  %v1122_v55 = vpop.eup %1121  ;;  %vm637_vm12 = vweird.f32 %v1763_v1  ;;  %v667_v9 = vadd.f32 0.112945676, %v666_v33  ;;  %v423_v22 = vadd.f32 0.001143296, %v422_v6 }
 0x122   :  { %v704_v60 = vmul.f32 %v703_v37, %v1507_v15  ;;  %v320_v61 = vsel %vm319_vm11, %v1120_v21, %v316_v50  ;;  %v633_v20 = vmul.f32 %v1122_v55, %v1763_v1  ;;  %vm1796_vm13 = vcmp.eq.f32.partialorder %v641_v28, 8.507059e+37 }
 0x123   :  { %v835_v34 = vmul.f32 %v819_v35, %v1456_v59  ;;  %v325_v51 = vsel %vm1776_vm9, %v324_v10, %v320_v61  ;;  %v644_v40 = vor.u32 1.1754944e-38, %v643_v25  ;;  %v361_v58 = vand.u32 2147483647, %v1783_v36 }
 0x124   :  { %v668_v42 = vmul.f32 %v667_v9, %v1453_v54  ;;  %v326_v47 = vmul.f32 %v325_v51, %v1618_v26  ;;  %v634_v19 = vsub.f32 1.0, %v633_v20  ;;  %v385_v59 = vadd.f32 0.014752088, %v384_v30 }
 0x125   :  { %903 = vmatmul.f32.gmra.mxu3 %v835_v34  ;;  %v705_v21 = vadd.f32 0.014752088, %v704_v60  ;;  %vm638_vm14 = vweird.f32 %v1122_v55  ;;  %v424_v31 = vmul.f32 %v423_v22, %v1519_v2  ;;  %v742_v16 = vmul.f32 3.8918573e-05, %v1555_v43 }
 0x126   :  { %v669_v49 = vadd.f32 0.4994258, %v668_v42  ;;  %v1124_v11 = vpop.eup %1123  ;;  %v1057_v52 = vclamps-f32 %v326_v47, 1.0  ;;  %v635_v62 = vmul.f32 %v1122_v55, %v634_v19  ;;  %v386_v56 = vmul.f32 %v385_v59, %v1476_v27  ;;  %vm639_vm15 = vmor %vm637_vm12, %vm638_vm14 }
 0x127   :  { %v706_v23 = vmul.f32 %v705_v21, %v1507_v15  ;;  %v353_v48 = vmul.f32 %v1124_v11, %v1783_v36  ;;  %v363_v26 = vand.u32 2147483648, %v1783_v36  ;;  %v425_v7 = vadd.f32 0.014752088, %v424_v31 }
 0x128   :  { %v670_v38 = vmul.f32 %v669_v49, %v1453_v54  ;;  %v812_v29 = vadd.f32 1.0, %v1057_v52  ;;  %v636_v6 = vadd.f32 %v1122_v55, %v635_v62  ;;  %v387_v57 = vadd.f32 0.112945676, %v386_v56 }
 0x129   :  { %v707_v5 = vadd.f32 0.112945676, %v706_v23  ;;  %v354_v28 = vsub.f32 1.0, %v353_v48  ;;  %v426_v25 = vmul.f32 %v425_v7, %v1519_v2  ;;  %v743_v33 = vadd.f32 0.001143296, %v742_v16 }
 0x12a   :  { %v1815_v10 = vadd.f32 1.0, %v670_v38  ;;  %v828_v37 = vmul.f32 %v812_v29, %v1471_v14  ;;  %v640_v35 = vsel %vm639_vm15, %v1122_v55, %v636_v6  ;;  %v388_v54 = vmul.f32 %v387_v57, %v1476_v27 }
 0x12b   :  { %v708_v50 = vmul.f32 %v707_v5, %v1507_v15  ;;  %v645_v30 = vsel %vm1796_vm13, %v644_v40, %v640_v35  ;;  %v355_v9 = vmul.f32 %v1124_v11, %v354_v28  ;;  %vm358_vm0 = vweird.f32 %v1124_v11 }
 0x12c   :  { %1125 = vrcp.f32 %v1815_v10  ;;  %882 = vmatmul.f32.gmra.mxu1 %v828_v37  ;;  %v646_v1 = vmul.f32 %v645_v30, %v1621_v13  ;;  %vm357_vm1 = vweird.f32 %v1783_v36  ;;  %vm1826_vm2 = vcmp.eq.f32.partialorder %v361_v58, 8.507059e+37 }
 0x12d   :  { %v389_v14 = vadd.f32 0.4994258, %v388_v54  ;;  %v356_v55 = vadd.f32 %v1124_v11, %v355_v9  ;;  %v709_v22 = vadd.f32 0.4994258, %v708_v50  ;;  %v427_v34 = vadd.f32 0.112945676, %v426_v25  ;;  %vm359_vm3 = vmor %vm357_vm1, %vm358_vm0 }
 0x12e   :  { %v744_v61 = vmul.f32 %v743_v33, %v1555_v43  ;;  %v1065_v20 = vclamps-f32 %v646_v1, 1.0  ;;  %v364_v17 = vor.u32 1.1754944e-38, %v363_v26  ;;  %v462_v40 = vmul.f32 3.8918573e-05, %v1612_v39 }
 0x12f   :  { %v390_v51 = vmul.f32 %v389_v14, %v1476_v27  ;;  %v360_v13 = vsel %vm359_vm3, %v1124_v11, %v356_v55  ;;  %v710_v36 = vmul.f32 %v709_v22, %v1507_v15  ;;  %v428_v58 = vmul.f32 %v427_v34, %v1519_v2 }
 0x130   :  { %v745_v42 = vadd.f32 0.014752088, %v744_v61  ;;  %v455_v47 = vmul.f32 %v1682_v32, %v1612_v39  ;;  %v820_v19 = vadd.f32 1.0, %v1065_v20  ;;  %v365_v59 = vsel %vm1826_vm2, %v364_v17, %v360_v13  ;;  %v2035_v13 = vld [vmem:[#allocation6_spill] sm:$0xff] }
 0x131   :  { %v1839_v21 = vadd.f32 1.0, %v390_v51  ;;  %v773_v27 = vmul.f32 %v1748_v45, %v1675_v12  ;;  %v366_v31 = vmul.f32 %v365_v59, %v1630_v8  ;;  %v1844_v16 = vadd.f32 1.0, %v710_v36 }
 0x132   :  { %v1126_v49 = vpop.eup %1125  ;;  %v429_v15 = vadd.f32 0.4994258, %v428_v58  ;;  %v836_v11 = vmul.f32 %v820_v19, %v1492_v46  ;;  %v746_v32 = vmul.f32 %v745_v42, %v1555_v43  ;;  %v1852_v62 = vmul.f32 %v1657_v44, %v1502_v4 }
 0x133   :  { %v673_v52 = vmul.f32 %v1126_v49, %v1815_v10  ;;  %1127 = vrcp.f32 %v1839_v21  ;;  %v1058_v56 = vclamps-f32 %v366_v31, 1.0  ;;  %v681_v45 = vand.u32 2147483647, %v1815_v10 }
 0x134   :  { %v463_v23 = vadd.f32 0.001143296, %v462_v40  ;;  %v1857_v8 = vmul.f32 %v1673_v24, %v1555_v43  ;;  %906 = vmatmul.f32.gmra.mxu3 %v836_v11  ;;  %v683_v48 = vand.u32 2147483648, %v1815_v10  ;;  %1129 = vrcp.f32 %v1844_v16 }
 0x135   :  { %v674_v46 = vsub.f32 1.0, %v673_v52  ;;  %v1861_v26 = vadd.f32 0.05243302, %v455_v47  ;;  %v1863_v38 = vadd.f32 0.0036580483, %v773_v27  ;;  %v813_v4 = vadd.f32 1.0, %v1058_v56 }
 0x136   :  { %vm677_vm4 = vweird.f32 %v1815_v10  ;;  %vm678_vm5 = vweird.f32 %v1126_v49  ;;  %v430_v7 = vmul.f32 %v429_v15, %v1519_v2  ;;  %v747_v29 = vadd.f32 0.112945676, %v746_v32 }
 0x137   :  { %v675_v44 = vmul.f32 %v1126_v49, %v674_v46  ;;  %v829_v24 = vmul.f32 %v813_v4, %v1529_v53  ;;  %vm1868_vm6 = vcmp.eq.f32.partialorder %v681_v45, 8.507059e+37  ;;  %v464_v57 = vmul.f32 %v463_v23, %v1612_v39  ;;  %vm679_vm7 = vmor %vm677_vm4, %vm678_vm5 }
 0x138   :  { %v782_v5 = vmul.f32 3.8918573e-05, %v1675_v12  ;;  %v684_v33 = vor.u32 1.1754944e-38, %v683_v48  ;;  %v1874_v37 = vadd.f32 1.0, %v430_v7  ;;  %v748_v35 = vmul.f32 %v747_v29, %v1555_v43 }
 0x139   :  { %v1128_v28 = vpop.eup %1127  ;;  %v676_v25 = vadd.f32 %v1126_v49, %v675_v44  ;;  %885 = vmatmul.f32.gmra.mxu1 %v829_v24  ;;  %vm397_vm8 = vweird.f32 %v1839_v21  ;;  %v465_v53 = vadd.f32 0.014752088, %v464_v57  ;;  %v401_v9 = vand.u32 2147483647, %v1839_v21 }
 0x13a   :  { %v393_v2 = vmul.f32 %v1128_v28, %v1839_v21  ;;  %v783_v54 = vadd.f32 0.001143296, %v782_v5  ;;  %v1130_v50 = vpop.eup %1129  ;;  %v403_v1 = vand.u32 2147483648, %v1839_v21  ;;  %1131 = vrcp.f32 %v1874_v37 }
 0x13b   :  { %v680_v30 = vsel %vm679_vm7, %v1126_v49, %v676_v25  ;;  %v713_v10 = vmul.f32 %v1130_v50, %v1844_v16  ;;  %vm717_vm9 = vweird.f32 %v1844_v16  ;;  %vm398_vm10 = vweird.f32 %v1128_v28 }
 0x13c   :  { %v685_v60 = vsel %vm1868_vm6, %v684_v33, %v680_v30  ;;  %v394_v14 = vsub.f32 1.0, %v393_v2  ;;  %v721_v22 = vand.u32 2147483647, %v1844_v16  ;;  %v749_v34 = vadd.f32 0.4994258, %v748_v35  ;;  %vm399_vm13 = vmor %vm397_vm8, %vm398_vm10 }
 0x13d   :  { %v686_v55 = vmul.f32 %v685_v60, %v1634_v63  ;;  %v714_v20 = vsub.f32 1.0, %v713_v10  ;;  %v466_v17 = vmul.f32 %v465_v53, %v1612_v39  ;;  %v784_v51 = vmul.f32 %v783_v54, %v1675_v12 }
 0x13e   :  { %v395_v61 = vmul.f32 %v1128_v28, %v394_v14  ;;  %vm1892_vm11 = vcmp.eq.f32.partialorder %v401_v9, 8.507059e+37  ;;  %v723_v36 = vand.u32 2147483648, %v1844_v16  ;;  %v750_v58 = vmul.f32 %v749_v34, %v1555_v43  ;;  %v2033_v43 = vld [vmem:[#allocation9_spill] sm:$0xff] }
 0x13f   :  { %v1066_v40 = vclamps-f32 %v686_v55, 1.0  ;;  %v404_v42 = vor.u32 1.1754944e-38, %v403_v1  ;;  %v715_v47 = vmul.f32 %v1130_v50, %v714_v20  ;;  %vm718_vm12 = vweird.f32 %v1130_v50 }
 0x140   :  { %v396_v63 = vadd.f32 %v1128_v28, %v395_v61  ;;  %v1132_v19 = vpop.eup %1131  ;;  %v1901_v49 = vadd.f32 1.0, %v750_v58  ;;  %v467_v27 = vadd.f32 0.112945676, %v466_v17  ;;  %v785_v31 = vadd.f32 0.014752088, %v784_v51  ;;  %vm719_vm15 = vmor %vm717_vm9, %vm718_vm12 }
 0x141   :  { %v821_v59 = vadd.f32 1.0, %v1066_v40  ;;  %v716_v11 = vadd.f32 %v1130_v50, %v715_v47  ;;  %vm722_vm14 = vcmp.eq.f32.partialorder %v721_v22, 8.507059e+37  ;;  %v433_v52 = vmul.f32 %v1132_v19, %v1874_v37 }
 0x142   :  { %v400_v15 = vsel %vm399_vm13, %v1128_v28, %v396_v63  ;;  %v724_v45 = vor.u32 1.1754944e-38, %v723_v36  ;;  %1133 = vrcp.f32 %v1901_v49  ;;  %v441_v48 = vand.u32 2147483647, %v1874_v37 }
 0x143   :  { %v837_v32 = vmul.f32 %v821_v59, %v2033_v43  ;;  %v405_v56 = vsel %vm1892_vm11, %v404_v42, %v400_v15  ;;  %v720_v23 = vsel %vm719_vm15, %v1130_v50, %v716_v11  ;;  %v434_v46 = vsub.f32 1.0, %v433_v52  ;;  %v2034_v50 = vld [vmem:[#allocation10_spill] sm:$0xff]  ;;  %v2036_v42 = vld [vmem:[#allocation8_spill] sm:$0xff] }
 0x144   :  { %v406_v21 = vmul.f32 %v405_v56, %v1647_v3  ;;  %v725_v4 = vsel %vm722_vm14, %v724_v45, %v720_v23  ;;  %v443_v44 = vand.u32 2147483648, %v1874_v37  ;;  %v468_v7 = vmul.f32 %v467_v27, %v1612_v39 }
 0x145   :  { %909 = vmatmul.f32.gmra.mxu3 %v837_v32  ;;  %v786_v29 = vmul.f32 %v785_v31, %v1675_v12  ;;  %v726_v16 = vmul.f32 %v725_v4, %v1650_v41  ;;  %v435_v6 = vmul.f32 %v1132_v19, %v434_v46  ;;  %vm438_vm0 = vweird.f32 %v1132_v19 }
 0x146   :  { %v1059_v24 = vclamps-f32 %v406_v21, 1.0  ;;  %v457_v3 = vmul.f32 %v1861_v26, %v1612_v39  ;;  %v775_v57 = vmul.f32 %v1863_v38, %v1675_v12  ;;  %v469_v5 = vadd.f32 0.4994258, %v468_v7 }
 0x147   :  { %v787_v28 = vadd.f32 0.112945676, %v786_v29  ;;  %v1067_v33 = vclamps-f32 %v726_v16, 1.0  ;;  %v436_v35 = vadd.f32 %v1132_v19, %v435_v6  ;;  %vm437_vm1 = vweird.f32 %v1874_v37 }
 0x148   :  { %v814_v25 = vadd.f32 1.0, %v1059_v24  ;;  %v1134_v2 = vpop.eup %1133  ;;  %vm439_vm2 = vmor %vm437_vm1, %vm438_vm0  ;;  %vm442_vm3 = vcmp.eq.f32.partialorder %v441_v48, 8.507059e+37  ;;  %v444_v53 = vor.u32 1.1754944e-38, %v443_v44  ;;  %v470_v41 = vmul.f32 %v469_v5, %v1612_v39 }
 0x149   :  { %v788_v54 = vmul.f32 %v787_v28, %v1675_v12  ;;  %v822_v30 = vadd.f32 1.0, %v1067_v33  ;;  %v440_v9 = vsel %vm439_vm2, %v1132_v19, %v436_v35  ;;  %v753_v38 = vmul.f32 %v1134_v2, %v1901_v49 }
 0x14a   :  { %v830_v26 = vmul.f32 %v814_v25, %v2034_v50  ;;  %v776_v1 = vadd.f32 0.05243302, %v775_v57  ;;  %v445_v60 = vsel %vm442_vm3, %v444_v53, %v440_v9  ;;  %v471_v14 = vadd.f32 1.0, %v470_v41  ;;  %v2038_v50 = vld [vmem:[#allocation13_spill] sm:$0xff] }
 0x14b   :  { %v789_v10 = vadd.f32 0.4994258, %v788_v54  ;;  %v838_v37 = vmul.f32 %v822_v30, %v1580_v18  ;;  %v446_v55 = vmul.f32 %v445_v60, %v1852_v62  ;;  %v754_v22 = vsub.f32 1.0, %v753_v38  ;;  %v2039_v30 = vld [vmem:[#allocation11_spill] sm:$0xff] }
 0x14c   :  { %888 = vmatmul.f32.gmra.mxu1 %v830_v26  ;;  %v740_v34 = vadd.f32 1.1283791, %v1857_v8  ;;  %v761_v61 = vand.u32 2147483647, %v1901_v49  ;;  %v763_v20 = vand.u32 2147483648, %v1901_v49  ;;  %1135 = vrcp.f32 %v471_v14 }
 0x14d   :  { %912 = vmatmul.f32.gmra.mxu3 %v838_v37  ;;  %v1060_v17 = vclamps-f32 %v446_v55, 1.0  ;;  %v755_v51 = vmul.f32 %v1134_v2, %v754_v22  ;;  %vm758_vm4 = vweird.f32 %v1134_v2  ;;  %v790_v40 = vmul.f32 %v789_v10, %v1675_v12  ;;  %v1106_v37 = vld [vmem:[%s1997_s4] ss:$0 sm:$0xff]  ;;  %v2040_v55 = vld [vmem:[#allocation12_spill] sm:$0xff] }
 0x14e   :  { %v143_v36 = vmul.f32 0.5, %v2035_v13  ;;  %v458_v58 = vadd.f32 0.18741608, %v457_v3  ;;  %v777_v18 = vmul.f32 %v776_v1, %v1675_v12  ;;  %vm757_vm5 = vweird.f32 %v1901_v49  ;;  %v2037_v49 = vld [vmem:[#allocation7_spill] sm:$0xff] }
 0x14f   :  { %v815_v62 = vadd.f32 1.0, %v1060_v17  ;;  %v756_v63 = vadd.f32 %v1134_v2, %v755_v51  ;;  %v791_v8 = vadd.f32 1.0, %v790_v40  ;;  %v741_v47 = vmul.f32 %v740_v34, %v2036_v42  ;;  %vm759_vm6 = vmor %vm757_vm5, %vm758_vm4 }
 0x150   :  { %v764_v19 = vor.u32 1.1754944e-38, %v763_v20  ;;  %vm762_vm7 = vcmp.eq.f32.partialorder %v761_v61, 8.507059e+37  ;;  %v459_v15 = vmul.f32 %v458_v58, %v1612_v39  ;;  %v778_v11 = vadd.f32 0.18741608, %v777_v18 }
 0x151   :  { %v831_v59 = vmul.f32 %v815_v62, %v143_v36  ;;  %v760_v27 = vsel %vm759_vm6, %v1134_v2, %v756_v63  ;;  %1137 = vrcp.f32 %v791_v8  ;;  %v151_v21 = vmul.f32 0.5, %v2037_v49 }
 0x152   :  { %v1136_v31 = vpop.eup %1135  ;;  %v765_v52 = vsel %vm762_vm7, %v764_v19, %v760_v27  ;;  %v460_v23 = vadd.f32 1.1283791, %v459_v15  ;;  %v779_v46 = vmul.f32 %v778_v11, %v1675_v12  ;;  %v483_v48 = vand.u32 2147483648, %v471_v14 }
 0x153   :  { %v766_v43 = vmul.f32 %v765_v52, %v741_v47  ;;  %v473_v32 = vmul.f32 %v1136_v31, %v471_v14  ;;  %vm478_vm8 = vweird.f32 %v1136_v31  ;;  %v481_v29 = vand.u32 2147483647, %v471_v14 }
 0x154   :  { %891 = vmatmul.f32.gmra.mxu1 %v831_v59  ;;  %vm477_vm9 = vweird.f32 %v471_v14  ;;  %v461_v6 = vmul.f32 %v460_v23, %v1588_v0  ;;  %v484_v3 = vor.u32 1.1754944e-38, %v483_v48  ;;  %v780_v5 = vadd.f32 1.1283791, %v779_v46 }
 0x155   :  { %v1068_v56 = vclamps-f32 %v766_v43, 1.0  ;;  %v474_v45 = vsub.f32 1.0, %v473_v32  ;;  %vm479_vm10 = vmor %vm477_vm9, %vm478_vm8  ;;  %vm482_vm11 = vcmp.eq.f32.partialorder %v481_v29, 8.507059e+37  ;;  %v803_v12 = vand.u32 2147483648, %v791_v8 }
 0x156   :  { %v801_v35 = vand.u32 2147483647, %v791_v8  ;;  %vm797_vm13 = vweird.f32 %v791_v8  ;;  %v781_v0 = vmul.f32 %v780_v5, %v2038_v50  ;;  %v144_v9 = vmul.f32 0.5, %v2039_v30 }
 0x157   :  { %v1138_v4 = vpop.eup %1137  ;;  %v823_v44 = vadd.f32 1.0, %v1068_v56  ;;  %v475_v7 = vmul.f32 %v1136_v31, %v474_v45  ;;  %v804_v54 = vor.u32 1.1754944e-38, %v803_v12  ;;  %v152_v22 = vmul.f32 0.5, %v2040_v55 }
 0x158   :  { %v793_v24 = vmul.f32 %v1138_v4, %v791_v8  ;;  %vm798_vm12 = vweird.f32 %v1138_v4  ;;  %vm802_vm15 = vcmp.eq.f32.partialorder %v801_v35, 8.507059e+37 }
 0x159   :  { %v839_v39 = vmul.f32 %v823_v44, %v151_v21  ;;  %v476_v16 = vadd.f32 %v1136_v31, %v475_v7  ;;  %vm799_vm14 = vmor %vm797_vm13, %vm798_vm12 }
 0x15a   :  { %v794_v57 = vsub.f32 1.0, %v793_v24 }
 0x15b   :  { %915 = vmatmul.f32.gmra.mxu3 %v839_v39  ;;  %v480_v28 = vsel %vm479_vm10, %v1136_v31, %v476_v16 }
 0x15c   :  { %v485_v25 = vsel %vm482_vm11, %v484_v3, %v480_v28  ;;  %v795_v33 = vmul.f32 %v1138_v4, %v794_v57 }
 0x15d   :  { %v486_v2 = vmul.f32 %v485_v25, %v461_v6 }
 0x15e   :  { %v796_v53 = vadd.f32 %v1138_v4, %v795_v33 }
 0x15f   :  { %v1061_v41 = vclamps-f32 %v486_v2, 1.0 }
 0x160   :  { %v800_v26 = vsel %vm799_vm14, %v1138_v4, %v796_v53 }
 0x161   :  { %v816_v38 = vadd.f32 1.0, %v1061_v41  ;;  %v805_v1 = vsel %vm802_vm15, %v804_v54, %v800_v26 }
 0x162   :  { %v806_v60 = vmul.f32 %v805_v1, %v781_v0 }
 0x163   :  { %v832_v14 = vmul.f32 %v816_v38, %v144_v9 }
 0x164   :  { %v1069_v10 = vclamps-f32 %v806_v60, 1.0 }
 0x165   :  { %894 = vmatmul.f32.gmra.mxu1 %v832_v14 }
 0x166   :  { %v824_v34 = vadd.f32 1.0, %v1069_v10 }
 0x168   :  { %v874_v61 = vpop.f32.mrf.mxu1  ;;  %v840_v20 = vmul.f32 %v824_v34, %v152_v22 }
 0x169   :  { %v1017_v17 = vadd.f32 %v1106_v37, %v874_v61 }
 0x16a   :  { %918 = vmatmul.f32.gmra.mxu3 %v840_v20 }
 0x16b   :  { %1033 = vst [vmem:[%s1998_s5] sm:$0xff] %v1017_v17 }
 0x18e   :  { %v898_v51 = vpop.f32.mrf.mxu3 }
 0x18f   :  { %v1025_v40 = vadd.f32 %v1106_v37, %v898_v51 }
 0x191   :  { %1041 = vst [vmem:[%s1998_s5 + $0x40] sm:$0xff] %v1025_v40 }
 0x192   :  { %v877_v13 = vpop.f32.mrf.mxu1 }
 0x193   :  { %v1018_v36 = vadd.f32 %v1106_v37, %v877_v13 }
 0x195   :  { %1034 = vst [vmem:[%s1998_s5 + $0x8] sm:$0xff] %v1018_v36 }
 0x19a   :  { %v880_v58 = vpop.f32.mrf.mxu1 }
 0x19b   :  { %v1019_v18 = vadd.f32 %v1106_v37, %v880_v58 }
 0x19c   :  { %v901_v62 = vpop.f32.mrf.mxu3 }
 0x19d   :  { %1035 = vst [vmem:[%s1998_s5 + $0x10] sm:$0xff] %v1019_v18  ;;  %v1026_v63 = vadd.f32 %v1106_v37, %v901_v62 }
 0x19f   :  { %1042 = vst [vmem:[%s1998_s5 + $0x48] sm:$0xff] %v1026_v63 }
 0x1a8   :  { %v904_v8 = vpop.f32.mrf.mxu3 }
 0x1a9   :  { %v1027_v42 = vadd.f32 %v1106_v37, %v904_v8  ;;  %v883_v47 = vpop.f32.mrf.mxu1 }
 0x1aa   :  { %v1020_v19 = vadd.f32 %v1106_v37, %v883_v47 }
 0x1ab   :  { %1043 = vst [vmem:[%s1998_s5 + $0x50] sm:$0xff] %v1027_v42 }
 0x1ac   :  { %1036 = vst [vmem:[%s1998_s5 + $0x18] sm:$0xff] %v1020_v19 }
 0x1b6   :  { %v886_v59 = vpop.f32.mrf.mxu1 }
 0x1b7   :  { %v1021_v27 = vadd.f32 %v1106_v37, %v886_v59  ;;  %v907_v31 = vpop.f32.mrf.mxu3 }
 0x1b8   :  { %v1028_v15 = vadd.f32 %v1106_v37, %v907_v31 }
 0x1b9   :  { %1037 = vst [vmem:[%s1998_s5 + $0x20] sm:$0xff] %v1021_v27 }
 0x1ba   :  { %1044 = vst [vmem:[%s1998_s5 + $0x58] sm:$0xff] %v1028_v15 }
 0x1c8   :  { %v910_v11 = vpop.f32.mrf.mxu3 }
 0x1c9   :  { %v889_v52 = vpop.f32.mrf.mxu1  ;;  %v1029_v43 = vadd.f32 %v1106_v37, %v910_v11 }
 0x1ca   :  { %v1022_v32 = vadd.f32 %v1106_v37, %v889_v52 }
 0x1cb   :  { %1045 = vst [vmem:[%s1998_s5 + $0x60] sm:$0xff] %v1029_v43 }
 0x1cc   :  { %1038 = vst [vmem:[%s1998_s5 + $0x28] sm:$0xff] %v1022_v32 }
 0x1d0   :  { %v913_v45 = vpop.f32.mrf.mxu3 }
 0x1d1   :  { %v892_v56 = vpop.f32.mrf.mxu1  ;;  %v1030_v21 = vadd.f32 %v1106_v37, %v913_v45 }
 0x1d2   :  { %v1023_v49 = vadd.f32 %v1106_v37, %v892_v56 }
 0x1d3   :  { %1046 = vst [vmem:[%s1998_s5 + $0x68] sm:$0xff] %v1030_v21 }
 0x1d4   :  { %1039 = vst [vmem:[%s1998_s5 + $0x30] sm:$0xff] %v1023_v49 }
 0x1de   :  { %v916_v23 = vpop.f32.mrf.mxu3 }
 0x1df   :  { %v1031_v46 = vadd.f32 %v1106_v37, %v916_v23 }
 0x1e1   :  { %1047 = vst [vmem:[%s1998_s5 + $0x70] sm:$0xff] %v1031_v46 }
 0x1e2   :  { %v895_v48 = vpop.f32.mrf.mxu1 }
 0x1e3   :  { %v1024_v4 = vadd.f32 %v1106_v37, %v895_v48 }
 0x1e5   :  { %1040 = vst [vmem:[%s1998_s5 + $0x38] sm:$0xff] %v1024_v4 }
 0x1ed   :  { %v919_v44 = vpop.f32.mrf.mxu3 }
 0x1ee   :  { %v1032_v7 = vadd.f32 %v1106_v37, %v919_v44 }
 0x1f0   :  { %1048 = vst [vmem:[%s1998_s5 + $0x78] sm:$0xff] %v1032_v7 }
 0x1f1   :  { %1053 = vsyncpa [#allocation4], 1 }

</bundles_post_ra>
